<compile_context>
chip_gen: v6e
topology: v6e:2x2x1
jax: 0.10.0
libtpu: 0.0.40
codegen_flags: <defaults>
</compile_context>

<pallas_src>
import jax
import jax.numpy as jnp
from jax.experimental import pallas as pl
from jax.experimental.pallas import tpu as pltpu


def _round_up(x, m):
    return (x + m - 1) // m * m


def mlp_kernel(x_ref, w1_ref, b1_ref, w2_ref, b2_ref, o_ref):
    # Hidden layer: bf16 operands on the MXU, f32 accumulation.
    h = jnp.dot(x_ref[...], w1_ref[...], preferred_element_type=jnp.float32)
    h = h + b1_ref[...]                       # f32 bias add, broadcast over rows
    # dropout (eval mode) == identity; ReLU kept in f32.
    h = jnp.maximum(h, 0.0)
    # Output layer: cast activations back to bf16 for the MXU, f32 accumulate.
    out = jnp.dot(h.astype(w2_ref.dtype), w2_ref[...],
                  preferred_element_type=jnp.float32)
    o_ref[...] = (out + b2_ref[...]).astype(o_ref.dtype)


def mlp_forward(x_nchw, w1, b1, w2, b2, *, block_m=256):
    """x_nchw: (B, C, H, W).  w1: (dim_in, dim_hidden), b1: (dim_hidden,),
    w2: (dim_hidden, dim_out), b2: (dim_out,).  Returns (B, dim_out) f32."""
    B = x_nchw.shape[0]
    dim_in = x_nchw.shape[1] * x_nchw.shape[-2] * x_nchw.shape[-1]
    dim_hidden = w1.shape[1]
    dim_out = w2.shape[1]

    x = x_nchw.reshape(B, dim_in)             # == x.view(-1, C*H*W)

    # Pad every matmul dimension to lane/MXU-friendly sizes (zeros are exact:
    # padded hidden cols stay 0 through bias/ReLU and padded W2 rows are 0).
    K = _round_up(dim_in, 128)                # contraction depth, layer 1
    Hp = _round_up(dim_hidden, 128)           # hidden / contraction, layer 2
    Np = _round_up(dim_out, 128)              # output lanes
    Mp = _round_up(B, block_m)                # batch rows (MXU sublanes)

    bf16 = jnp.bfloat16
    x_p = jnp.zeros((Mp, K), bf16).at[:B, :dim_in].set(x.astype(bf16))
    w1_p = jnp.zeros((K, Hp), bf16).at[:dim_in, :dim_hidden].set(w1.astype(bf16))
    b1_p = jnp.zeros((1, Hp), jnp.float32).at[0, :dim_hidden].set(
        b1.astype(jnp.float32))
    w2_p = jnp.zeros((Hp, Np), bf16).at[:dim_hidden, :dim_out].set(w2.astype(bf16))
    b2_p = jnp.zeros((1, Np), jnp.float32).at[0, :dim_out].set(
        b2.astype(jnp.float32))

    grid = (Mp // block_m,)
    flops = 2 * Mp * (K * Hp + Hp * Np)
    bytes_accessed = (x_p.size * 2 + w1_p.size * 2 + w2_p.size * 2
                      + b1_p.size * 4 + b2_p.size * 4 + Mp * Np * 4)

    out_p = pl.pallas_call(
        mlp_kernel,
        out_shape=jax.ShapeDtypeStruct((Mp, Np), jnp.float32),
        grid_spec=pltpu.PrefetchScalarGridSpec(
            num_scalar_prefetch=0,
            grid=grid,
            in_specs=[
                pl.BlockSpec((block_m, K), lambda i: (i, 0)),   # x tile (pipelined)
                pl.BlockSpec((K, Hp), lambda i: (0, 0)),        # W1 resident
                pl.BlockSpec((1, Hp), lambda i: (0, 0)),        # b1 resident
                pl.BlockSpec((Hp, Np), lambda i: (0, 0)),       # W2 resident
                pl.BlockSpec((1, Np), lambda i: (0, 0)),        # b2 resident
            ],
            out_specs=pl.BlockSpec((block_m, Np), lambda i: (i, 0)),
        ),
        compiler_params=pltpu.CompilerParams(
            dimension_semantics=("parallel",)),
        cost_estimate=pl.CostEstimate(
            flops=flops, transcendentals=0, bytes_accessed=bytes_accessed),
    )(x_p, w1_p, b1_p, w2_p, b2_p)

    # Slice back to the real (un-padded) batch and output width.
    return out_p[:B, :dim_out]


def init_params(key, dim_in, dim_hidden, dim_out, dtype=jnp.float32):
    """Deterministic PyTorch-style Linear init: U(-1/sqrt(fan_in), 1/sqrt(fan_in))."""
    k1, k2, k3, k4 = jax.random.split(key, 4)
    bound1 = 1.0 / jnp.sqrt(dim_in)
    bound2 = 1.0 / jnp.sqrt(dim_hidden)
    w1 = jax.random.uniform(k1, (dim_in, dim_hidden), dtype, -bound1, bound1)
    b1 = jax.random.uniform(k2, (dim_hidden,), dtype, -bound1, bound1)
    w2 = jax.random.uniform(k3, (dim_hidden, dim_out), dtype, -bound2, bound2)
    b2 = jax.random.uniform(k4, (dim_out,), dtype, -bound2, bound2)
    return w1, b1, w2, b2


if __name__ == "__main__":
    key = jax.random.PRNGKey(0)
    kx, kp = jax.random.split(key)

    # Small shapes consistent with the module's forward:
    # input (B, C, H, W) -> dim_in = C*H*W
    B, C, H, W = 2, 4, 16, 16
    dim_in = C * H * W          # 1024
    dim_hidden = 32
    dim_out = 10

    x = jax.random.normal(kx, (B, C, H, W), jnp.float32)
    w1, b1, w2, b2 = init_params(kp, dim_in, dim_hidden, dim_out)

    out = jax.block_until_ready(mlp_forward(x, w1, b1, w2, b2))

    # References (dropout eval-mode == identity):
    #  (1) mixed-precision ref matching the kernel's bf16-operand / f32-accumulate
    #  (2) pure f32 ref, looser tolerance for bf16 rounding of operands.
    x_flat = x.reshape(B, dim_in)
    h_ref = jnp.maximum(
        jnp.dot(x_flat.astype(jnp.bfloat16), w1.astype(jnp.bfloat16),
                preferred_element_type=jnp.float32) + b1, 0.0)
    ref_mixed = jnp.dot(h_ref.astype(jnp.bfloat16), w2.astype(jnp.bfloat16),
                        preferred_element_type=jnp.float32) + b2
    ref_f32 = jnp.maximum(x_flat @ w1 + b1, 0.0) @ w2 + b2

    assert out.shape == (B, dim_out)
    assert jnp.allclose(out, ref_mixed, atol=1e-2, rtol=1e-2), \
        float(jnp.max(jnp.abs(out - ref_mixed)))
    assert jnp.allclose(out, ref_f32, atol=5e-2, rtol=5e-2), \
        float(jnp.max(jnp.abs(out - ref_f32)))

    print("KERNEL_OK")
</pallas_src>

<mosaic_0001>
module attributes {stable_mosaic.version = 11 : i64} {
  func.func @mlp_kernel(%arg0: i32, %arg1: memref<256x1024xbf16, #tpu.memory_space<vmem>>, %arg2: memref<1024x128xbf16, #tpu.memory_space<vmem>>, %arg3: memref<1x128xf32, #tpu.memory_space<vmem>>, %arg4: memref<128x128xbf16, #tpu.memory_space<vmem>>, %arg5: memref<1x128xf32, #tpu.memory_space<vmem>>, %arg6: memref<256x128xf32, #tpu.memory_space<vmem>>) attributes {dimension_semantics = [#tpu.dimension_semantics<parallel>], iteration_bounds = array<i64: 1>, scalar_prefetch = 0 : i64, scratch_operands = 0 : i64, tpu.core_type = #tpu.core_type<tc>, window_params = [{transform_indices = @transform_0, window_bounds = array<i64: 256, 1024>}, {pipeline_mode = #tpu.pipeline_mode<synchronous>, transform_indices = @transform_1, window_bounds = array<i64: 1024, 128>}, {pipeline_mode = #tpu.pipeline_mode<synchronous>, transform_indices = @transform_2, window_bounds = array<i64: 1, 128>}, {pipeline_mode = #tpu.pipeline_mode<synchronous>, transform_indices = @transform_3, window_bounds = array<i64: 128, 128>}, {pipeline_mode = #tpu.pipeline_mode<synchronous>, transform_indices = @transform_4, window_bounds = array<i64: 1, 128>}, {transform_indices = @transform_5, window_bounds = array<i64: 256, 128>}]} {
    %c0 = arith.constant 0 : index
    %c0_0 = arith.constant 0 : index
    %0 = vector.load %arg1[%c0, %c0_0] : memref<256x1024xbf16, #tpu.memory_space<vmem>>, vector<256x1024xbf16>
    %c0_1 = arith.constant 0 : index
    %c0_2 = arith.constant 0 : index
    %1 = vector.load %arg2[%c0_1, %c0_2] : memref<1024x128xbf16, #tpu.memory_space<vmem>>, vector<1024x128xbf16>
    %cst = arith.constant dense<0.000000e+00> : vector<256x128xf32>
    %2 = tpu.matmul %0, %1, %cst {dimension_numbers = #tpu.dot_dimension_numbers<[1], [0], [0], [1], [0, 0, 1, 1], [], []>} : vector<256x1024xbf16>, vector<1024x128xbf16>, vector<256x128xf32> -> vector<256x128xf32>
    %c0_3 = arith.constant 0 : index
    %c0_4 = arith.constant 0 : index
    %3 = vector.load %arg3[%c0_3, %c0_4] : memref<1x128xf32, #tpu.memory_space<vmem>>, vector<1x128xf32>
    %4 = vector.broadcast %3 : vector<1x128xf32> to vector<256x128xf32>
    %5 = arith.addf %2, %4 : vector<256x128xf32>
    %cst_5 = arith.constant 0.000000e+00 : f32
    %6 = vector.broadcast %cst_5 : f32 to vector<256x128xf32>
    %7 = arith.maximumf %5, %6 : vector<256x128xf32>
    %8 = arith.truncf %7 : vector<256x128xf32> to vector<256x128xbf16>
    %c0_6 = arith.constant 0 : index
    %c0_7 = arith.constant 0 : index
    %9 = vector.load %arg4[%c0_6, %c0_7] : memref<128x128xbf16, #tpu.memory_space<vmem>>, vector<128x128xbf16>
    %cst_8 = arith.constant dense<0.000000e+00> : vector<256x128xf32>
    %10 = tpu.matmul %8, %9, %cst_8 {dimension_numbers = #tpu.dot_dimension_numbers<[1], [0], [0], [1], [0, 0, 1, 1], [], []>} : vector<256x128xbf16>, vector<128x128xbf16>, vector<256x128xf32> -> vector<256x128xf32>
    %c0_9 = arith.constant 0 : index
    %c0_10 = arith.constant 0 : index
    %11 = vector.load %arg5[%c0_9, %c0_10] : memref<1x128xf32, #tpu.memory_space<vmem>>, vector<1x128xf32>
    %12 = vector.broadcast %11 : vector<1x128xf32> to vector<256x128xf32>
    %13 = arith.addf %10, %12 : vector<256x128xf32>
    %c0_11 = arith.constant 0 : index
    %c0_12 = arith.constant 0 : index
    %14 = vector.load %arg6[%c0_11, %c0_12] : memref<256x128xf32, #tpu.memory_space<vmem>>, vector<256x128xf32>
    tpu.vector_store %arg6[%c0_11, %c0_12], %13 {strides = array<i32>} : memref<256x128xf32, #tpu.memory_space<vmem>>, vector<256x128xf32>,
    return
  }
  func.func @transform_0(%arg0: i32) -> (i32, i32) {
    %c0_i32 = arith.constant 0 : i32
    %c0_i32_0 = arith.constant 0 : i32
    return %arg0, %c0_i32 : i32, i32
  }
  func.func @transform_1(%arg0: i32) -> (i32, i32) {
    %c0_i32 = arith.constant 0 : i32
    %c0_i32_0 = arith.constant 0 : i32
    %c0_i32_1 = arith.constant 0 : i32
    return %c0_i32, %c0_i32_0 : i32, i32
  }
  func.func @transform_2(%arg0: i32) -> (i32, i32) {
    %c0_i32 = arith.constant 0 : i32
    %c0_i32_0 = arith.constant 0 : i32
    %c0_i32_1 = arith.constant 0 : i32
    return %c0_i32, %c0_i32_0 : i32, i32
  }
  func.func @transform_3(%arg0: i32) -> (i32, i32) {
    %c0_i32 = arith.constant 0 : i32
    %c0_i32_0 = arith.constant 0 : i32
    %c0_i32_1 = arith.constant 0 : i32
    return %c0_i32, %c0_i32_0 : i32, i32
  }
  func.func @transform_4(%arg0: i32) -> (i32, i32) {
    %c0_i32 = arith.constant 0 : i32
    %c0_i32_0 = arith.constant 0 : i32
    %c0_i32_1 = arith.constant 0 : i32
    return %c0_i32, %c0_i32_0 : i32, i32
  }
  func.func @transform_5(%arg0: i32) -> (i32, i32) {
    %c0_i32 = arith.constant 0 : i32
    %c0_i32_0 = arith.constant 0 : i32
    return %arg0, %c0_i32 : i32, i32
  }
}

</mosaic_0001>

<bundles_post_ra>
// kernel: tpu_custom_call.1
= control target key start
LH: loop header
LB: loop body
LE: loop exit
PB: predicated region body
PF: predicated region fallthrough
CT: control target
= control target key end

     0   :  { %10 = vsyncpa [#allocation3], 0  ;;  %s3716_s0 = inlined_call_operand.hbm [shape: bf16[256,1024], index: 0, kind: input, shape index: {}]   ;;  %s3717_s1 = inlined_call_operand.hbm [shape: bf16[1024,128], index: 1, kind: input, shape index: {}]   ;;  %s3718_s2 = inlined_call_operand.vmem [shape: f32[1,128], index: 2, kind: input, shape index: {}]   ;;  %s3719_s3 = inlined_call_operand.hbm [shape: bf16[128,128], index: 3, kind: input, shape index: {}]   ;;  %s3720_s4 = inlined_call_operand.vmem [shape: f32[1,128], index: 4, kind: input, shape index: {}]   ;;  %s3721_s5 = inlined_call_operand.hbm [shape: f32[256,128], index: 5, kind: output, shape index: {}]  }
   0x1   :  { %11 = vsyncpa [#allocation6], 0 }
   0x2   :  { %12 = vsyncpa [#allocation4], 0  ;;  %s3230_s18 = smov [#allocation5]  }
   0x3   :  { %s30_s19 = sshll.u32 %s3230_s18, 4  ;;  %s31_s19 = int_to_ptr.vmem [resolvable:$true] %s30_s19 }
   0x4   :  { %s3152_s20 = scalar_lea.vmem %s31_s19, 8192  ;;  %p3157_p1 = scmp.lt.s32.totalorder %s31_s19, %s31_s19 }
   0x5   :  { %p3153_p0 = scmp.ne.s32.totalorder %s31_s19, %s3152_s20  ;;  %p3158_p2 = scmp.lt.s32.totalorder %s3152_s20, %s3152_s20 }
   0x7   :  { %p3159_p3 = por %p3158_p2, %p3157_p1 }
   0x9   :  { %p3160_p4 = pnand %p3159_p3, %p3153_p0 }
   0xb   :  { %3163 = shalt.err (!%p3160_p4)
}
   0xc   :  { %s3231_s21 = smov 64   ;;  %s3232_s22 = smov 4  }
   0xd   :  { %36 = dma.hbm_to_vmem [thread:$0]  %s3717_s1, 8192, %s31_s19, [#allocation6], %s3231_s21, %s3231_s21, %s3232_s22  }
   0xe   :  { %s3233_s25 = smov [#allocation2]  }
   0xf   :  { %s18_s26 = sshll.u32 %s3233_s25, 4  ;;  %s19_s26 = int_to_ptr.vmem [resolvable:$true] %s18_s26 }
  0x10   :  { %s3172_s27 = scalar_lea.vmem %s19_s26, 16384  ;;  %p3177_p6 = scmp.lt.s32.totalorder %s19_s26, %s19_s26 }
  0x11   :  { %p3173_p5 = scmp.ne.s32.totalorder %s19_s26, %s3172_s27  ;;  %p3178_p7 = scmp.lt.s32.totalorder %s3172_s27, %s3172_s27 }
  0x13   :  { %p3179_p8 = por %p3178_p7, %p3177_p6 }
  0x15   :  { %p3180_p9 = pnand %p3179_p8, %p3173_p5 }
  0x17   :  { %3183 = shalt.err (!%p3180_p9)
}
  0x18   :  { %s3234_s28 = smov 512   ;;  %s3235_s29 = smov 32  }
  0x19   :  { %24 = dma.hbm_to_vmem [thread:$0]  %s3716_s0, 16384, %s19_s26, [#allocation3], %s3234_s28, %s3234_s28, %s3235_s29  }
  0x1a   :  { %s3236_s7 = smov [#allocation7]  }
  0x1b   :  { %s44_s8 = sshll.u32 %s3236_s7, 4  ;;  %s45_s8 = int_to_ptr.vmem [resolvable:$true] %s44_s8 }
  0x1c   :  { %s3192_s1 = scalar_lea.vmem %s45_s8, 1024  ;;  %p3197_p11 = scmp.lt.s32.totalorder %s45_s8, %s45_s8 }
  0x1d   :  { %p3193_p10 = scmp.ne.s32.totalorder %s45_s8, %s3192_s1  ;;  %p3198_p12 = scmp.lt.s32.totalorder %s3192_s1, %s3192_s1 }
  0x1f   :  { %p3199_p13 = por %p3198_p12, %p3197_p11 }
  0x21   :  { %p3200_p0 = pnand %p3199_p13, %p3193_p10 }
  0x23   :  { %3203 = shalt.err (!%p3200_p0)
}
  0x24   :  { %50 = dma.hbm_to_vmem [thread:$0]  %s3719_s3, 1024, %s45_s8, [#allocation6], %s3231_s21, %s3231_s21, %s3232_s22  }
  0x25   :  { %3224 = dma.done.wait [#allocation3], 16384  }
  0x26   :  { %3225 = vsyncadd [#allocation3], 4294950912 }
  0x27   :  { %3226 = dma.done.wait [#allocation6], 9216  }
  0x28   :  { %3227 = vsyncadd [#allocation6], 4294958080  ;;  %v3072_v0 = vld [vmem:[#allocation5 + $0x78] sm:$0xff]   ;;  %v3074_v2 = vld [vmem:[#allocation5 + $0x70] sm:$0xff]  }
  0x29   :  { %v3073_v1 = vld [vmem:[#allocation5 + $0x38] sm:$0xff]   ;;  %2526 = vmatprep.subr.bf16.mxu0 %v3072_v0  ;;  %3046 = vmatprep.subr.bf16.mxu1 %v3072_v0  ;;  %v3075_v3 = vld [vmem:[#allocation5 + $0x30] sm:$0xff]   ;;  %v3076_v4 = vld [vmem:[#allocation5 + $0x68] sm:$0xff]  }
  0x2a   :  { %2527 = vmatpush3.bf16.msra.mxu0 %v3073_v1  ;;  %3054 = vmatpush3.bf16.msra.mxu1 %v3073_v1  ;;  %v3077_v5 = vld [vmem:[#allocation5 + $0x28] sm:$0xff]   ;;  %v3078_v6 = vld [vmem:[#allocation5 + $0x60] sm:$0xff]   ;;  %v3080_v8 = vld [vmem:[#allocation5 + $0x58] sm:$0xff]  }
  0x2b   :  { %2528 = vmatprep.subr.bf16.mxu0 %v3074_v2  ;;  %3047 = vmatprep.subr.bf16.mxu1 %v3074_v2  ;;  %v3079_v7 = vld [vmem:[#allocation5 + $0x20] sm:$0xff]   ;;  %v3081_v9 = vld [vmem:[#allocation5 + $0x18] sm:$0xff]   ;;  %v3082_v10 = vld [vmem:[#allocation5 + $0x50] sm:$0xff]  }
  0x2c   :  { %v63_v11 = vld [vmem:[#allocation2] sm:$0xff]  ;;  %v3083_v17 = vld [vmem:[#allocation5 + $0x10] sm:$0xff]   ;;  %v3084_v18 = vld [vmem:[#allocation5 + $0x48] sm:$0xff]  }
  0x2d   :  { %v67_v12 = vld [vmem:[#allocation2 + $0x20] sm:$0xff]  ;;  %v3085_v19 = vld [vmem:[#allocation5 + $0x8] sm:$0xff]   ;;  %v3088_v22 = vld [vmem:[#allocation5 + $0xf8] sm:$0xff]  }
  0x2e   :  { %2529 = vmatpush3.bf16.msra.mxu0 %v3075_v3  ;;  %3055 = vmatpush3.bf16.msra.mxu1 %v3075_v3  ;;  %v159_v13 = vld [vmem:[#allocation2 + $0x300] sm:$0xff]  ;;  %v2326_v14 = vcombine.high %v63_v11, %v67_v12  ;;  %v2325_v27 = vcombine.low %v63_v11, %v67_v12  ;;  %v3089_v29 = vld [vmem:[#allocation5 + $0xb8] sm:$0xff]   ;;  %v3090_v31 = vld [vmem:[#allocation5 + $0xf0] sm:$0xff]  }
  0x2f   :  { %2530 = vmatprep.subr.bf16.mxu0 %v3076_v4  ;;  %3048 = vmatprep.subr.bf16.mxu1 %v3076_v4  ;;  %v163_v15 = vld [vmem:[#allocation2 + $0x320] sm:$0xff]  ;;  %v3091_v33 = vld [vmem:[#allocation5 + $0xb0] sm:$0xff]   ;;  %v3092_v34 = vld [vmem:[#allocation5 + $0xe8] sm:$0xff]  }
  0x30   :  { %v2422_v16 = vcombine.high %v159_v13, %v163_v15  ;;  %1382 = vmatprep.mubr.bf16.mxu0 %v2326_v14  ;;  %v3086_v20 = vld [vmem:[#allocation5 + $0x40] sm:$0xff]   ;;  %v2421_v28 = vcombine.low %v159_v13, %v163_v15  ;;  %v3093_v41 = vld [vmem:[#allocation5 + $0xa8] sm:$0xff]   ;;  %v3096_v46 = vld [vmem:[#allocation5 + $0xd8] sm:$0xff]  }
  0x31   :  { %v3087_v21 = vld [vmem:[#allocation5] sm:$0xff]   ;;  %v3097_v53 = vld [vmem:[#allocation5 + $0x98] sm:$0xff]   ;;  %v3098_v56 = vld [vmem:[#allocation5 + $0xd0] sm:$0xff]  }
  0x32   :  { %2531 = vmatpush3.bf16.msra.mxu0 %v3077_v5  ;;  %3056 = vmatpush3.bf16.msra.mxu1 %v3077_v5  ;;  %v71_v23 = vld [vmem:[#allocation2 + $0x40] sm:$0xff]  ;;  %v3108_v55 = vld [vmem:[#allocation5 + $0x178] sm:$0xff]   ;;  %v3099_v58 = vld [vmem:[#allocation5 + $0x90] sm:$0xff]  }
  0x33   :  { %2532 = vmatprep.subr.bf16.mxu0 %v3078_v6  ;;  %3049 = vmatprep.subr.bf16.mxu1 %v3078_v6  ;;  %v75_v24 = vld [vmem:[#allocation2 + $0x60] sm:$0xff]  ;;  %v3109_v59 = vld [vmem:[#allocation5 + $0x138] sm:$0xff]   ;;  %v3100_v60 = vld [vmem:[#allocation5 + $0xc8] sm:$0xff]  }
  0x34   :  { %1478 = vmatprep.mubr.bf16.mxu1 %v2422_v16  ;;  %v167_v25 = vld [vmem:[#allocation2 + $0x340] sm:$0xff]  ;;  %v2334_v30 = vcombine.high %v71_v23, %v75_v24  ;;  %v2333_v39 = vcombine.low %v71_v23, %v75_v24  ;;  %v64_v63 = vld [vmem:[#allocation2 + $0x8] sm:$0xff]  ;;  %v3112_v1 = vld [vmem:[#allocation5 + $0x170] sm:$0xff]  }
  0x35   :  { %v171_v26 = vld [vmem:[#allocation2 + $0x360] sm:$0xff]  ;;  %v68_v0 = vld [vmem:[#allocation2 + $0x28] sm:$0xff]  ;;  %v3113_v2 = vld [vmem:[#allocation5 + $0x130] sm:$0xff]  }
  0x36   :  { %2533 = vmatpush3.bf16.msra.mxu0 %v3079_v7  ;;  %3057 = vmatpush3.bf16.msra.mxu1 %v3079_v7  ;;  %v2430_v32 = vcombine.high %v167_v25, %v171_v26  ;;  %v79_v35 = vld [vmem:[#allocation2 + $0x80] sm:$0xff]  ;;  %v2429_v40 = vcombine.low %v167_v25, %v171_v26  ;;  %v3101_v5 = vld [vmem:[#allocation5 + $0x88] sm:$0xff]   ;;  %v3104_v12 = vld [vmem:[#allocation5 + $0x1f8] sm:$0xff]  }
  0x37   :  { %2534 = vmatprep.subr.bf16.mxu0 %v3080_v8  ;;  %3050 = vmatprep.subr.bf16.mxu1 %v3080_v8  ;;  %v83_v36 = vld [vmem:[#allocation2 + $0xa0] sm:$0xff]  ;;  %v2328_v8 = vcombine.high %v64_v63, %v68_v0  ;;  %v3115_v11 = vld [vmem:[#allocation5 + $0x128] sm:$0xff]   ;;  %v3106_v23 = vld [vmem:[#allocation5 + $0x1f0] sm:$0xff]  }
  0x38   :  { %v175_v37 = vld [vmem:[#allocation2 + $0x380] sm:$0xff]  ;;  %v2342_v42 = vcombine.high %v79_v35, %v83_v36  ;;  %v2341_v51 = vcombine.low %v79_v35, %v83_v36  ;;  %v72_v16 = vld [vmem:[#allocation2 + $0x48] sm:$0xff] }
  0x39   :  { %v179_v38 = vld [vmem:[#allocation2 + $0x3a0] sm:$0xff] }
  0x3a   :  { %2535 = vmatpush3.bf16.msra.mxu0 %v3081_v9  ;;  %3058 = vmatpush3.bf16.msra.mxu1 %v3081_v9  ;;  %v3094_v43 = vld [vmem:[#allocation5 + $0xe0] sm:$0xff]   ;;  %v2438_v44 = vcombine.high %v175_v37, %v179_v38  ;;  %v2437_v52 = vcombine.low %v175_v37, %v179_v38  ;;  %v3111_v37 = vld [vmem:[#allocation5 + $0x1a8] sm:$0xff]  }
  0x3b   :  { %2536 = vmatprep.subr.bf16.mxu0 %v3082_v10  ;;  %3051 = vmatprep.subr.bf16.mxu1 %v3082_v10  ;;  %v3095_v45 = vld [vmem:[#allocation5 + $0xa0] sm:$0xff]   ;;  %v3114_v10 = vld [vmem:[#allocation5 + $0x168] sm:$0xff]  }
  0x3c   :  { %v87_v47 = vld [vmem:[#allocation2 + $0xc0] sm:$0xff] }
  0x3d   :  { %v91_v48 = vld [vmem:[#allocation2 + $0xe0] sm:$0xff] }
  0x3e   :  { %2537 = vmatpush3.bf16.msra.mxu0 %v3083_v17  ;;  %3059 = vmatpush3.bf16.msra.mxu1 %v3083_v17  ;;  %v183_v49 = vld [vmem:[#allocation2 + $0x3c0] sm:$0xff]  ;;  %v2350_v54 = vcombine.high %v87_v47, %v91_v48  ;;  %v2349_v3 = vcombine.low %v87_v47, %v91_v48  ;;  %v76_v17 = vld [vmem:[#allocation2 + $0x68] sm:$0xff]  ;;  %v3128_v48 = vld [vmem:[#allocation5 + $0x1d8] sm:$0xff]  }
  0x3f   :  { %2538 = vmatprep.subr.bf16.mxu0 %v3084_v18  ;;  %3052 = vmatprep.subr.bf16.mxu1 %v3084_v18  ;;  %v187_v50 = vld [vmem:[#allocation2 + $0x3e0] sm:$0xff]  ;;  %v2327_v18 = vcombine.low %v64_v63, %v68_v0  ;;  %v3125_v47 = vld [vmem:[#allocation5 + $0x108] sm:$0xff]  }
  0x40   :  { %v2446_v57 = vcombine.high %v183_v49, %v187_v50  ;;  %v95_v61 = vld [vmem:[#allocation2 + $0x100] sm:$0xff]  ;;  %v2445_v4 = vcombine.low %v183_v49, %v187_v50 }
  0x41   :  { %v99_v62 = vld [vmem:[#allocation2 + $0x120] sm:$0xff] }
  0x42   :  { %2539 = vmatpush3.bf16.msra.mxu0 %v3085_v19  ;;  %3060 = vmatpush3.bf16.msra.mxu1 %v3085_v19  ;;  %v2358_v6 = vcombine.high %v95_v61, %v99_v62  ;;  %v3102_v7 = vld [vmem:[#allocation5 + $0xc0] sm:$0xff]   ;;  %v2357_v19 = vcombine.low %v95_v61, %v99_v62  ;;  %v3131_v61 = vld [vmem:[#allocation5 + $0x190] sm:$0xff]   ;;  %v3132_v62 = vld [vmem:[#allocation5 + $0x1c8] sm:$0xff]  }
  0x43   :  { %2540 = vmatprep.subr.bf16.mxu0 %v3086_v20  ;;  %3053 = vmatprep.subr.bf16.mxu1 %v3086_v20  ;;  %v3103_v9 = vld [vmem:[#allocation5 + $0x80] sm:$0xff]   ;;  %v3105_v20 = vld [vmem:[#allocation5 + $0x1b8] sm:$0xff]  }
  0x44   :  { %v103_v13 = vld [vmem:[#allocation2 + $0x140] sm:$0xff] }
  0x45   :  { %v3116_v14 = vld [vmem:[#allocation5 + $0x160] sm:$0xff]  }
  0x46   :  { %2541 = vmatpush3.bf16.msra.mxu0 %v3087_v21  ;;  %3061 = vmatpush3.bf16.msra.mxu1 %v3087_v21  ;;  %v107_v15 = vld [vmem:[#allocation2 + $0x160] sm:$0xff] }
  0x47   :  { %2638 = vmatprep.subr.bf16.mxu1 %v3088_v22  ;;  %2750 = vmatprep.subr.bf16.mxu0 %v3108_v55  ;;  %v2366_v21 = vcombine.high %v103_v13, %v107_v15  ;;  %v2336_v22 = vcombine.high %v72_v16, %v76_v17  ;;  %v3117_v24 = vld [vmem:[#allocation5 + $0x120] sm:$0xff]  }
  0x48   :  { %v111_v25 = vld [vmem:[#allocation2 + $0x180] sm:$0xff] }
  0x49   :  { %1383 = vmatmul.mubr.bf16.vlgmr.msra.gmra.mxu0 %v2325_v27  ;;  %1479 = vmatmul.mubr.bf16.vlgmr.msra.gmra.mxu1 %v2421_v28  ;;  %v115_v26 = vld [vmem:[#allocation2 + $0x1a0] sm:$0xff]  ;;  %v3118_v27 = vld [vmem:[#allocation5 + $0x158] sm:$0xff]   ;;  %v80_v28 = vld [vmem:[#allocation2 + $0x88] sm:$0xff] }
  0x4a   :  { %2639 = vmatpush3.bf16.msra.mxu1 %v3089_v29  ;;  %1390 = vmatprep.mubr.bf16.mxu0 %v2334_v30  ;;  %v84_v29 = vld [vmem:[#allocation2 + $0xa8] sm:$0xff]  ;;  %v3107_v30 = vld [vmem:[#allocation5 + $0x1b0] sm:$0xff]   ;;  %v2374_v35 = vcombine.high %v111_v25, %v115_v26  ;;  %v3119_v38 = vld [vmem:[#allocation5 + $0x1e0] sm:$0xff]   ;;  %v2373_v49 = vcombine.low %v111_v25, %v115_v26 }
  0x4b   :  { %2640 = vmatprep.subr.bf16.mxu1 %v3090_v31  ;;  %1486 = vmatprep.mubr.bf16.mxu1 %v2430_v32  ;;  %v3110_v31 = vld [vmem:[#allocation5 + $0x1e8] sm:$0xff]   ;;  %v3120_v32 = vld [vmem:[#allocation5 + $0x118] sm:$0xff]   ;;  %v2344_v36 = vcombine.high %v80_v28, %v84_v29  ;;  %v2343_v50 = vcombine.low %v80_v28, %v84_v29  ;;  %v3127_v55 = vld [vmem:[#allocation5 + $0x100] sm:$0xff]  }
  0x4c   :  { %2751 = vmatpush3.bf16.msra.mxu0 %v3109_v59  ;;  %v96_v59 = vld [vmem:[#allocation2 + $0x108] sm:$0xff] }
  0x4d   :  { %2752 = vmatprep.subr.bf16.mxu0 %v3112_v1  ;;  %v124_v25 = vld [vmem:[#allocation2 + $0x1e8] sm:$0xff] }
  0x4e   :  { %2641 = vmatpush3.bf16.msra.mxu1 %v3091_v33  ;;  %v2365_v33 = vcombine.low %v103_v13, %v107_v15  ;;  %v147_v15 = vld [vmem:[#allocation2 + $0x2a0] sm:$0xff] }
  0x4f   :  { %2642 = vmatprep.subr.bf16.mxu1 %v3092_v34  ;;  %v2335_v34 = vcombine.low %v72_v16, %v76_v17  ;;  %v112_v16 = vld [vmem:[#allocation2 + $0x188] sm:$0xff] }
  0x50   :  { %2753 = vmatpush3.bf16.msra.mxu0 %v3113_v2  ;;  %v116_v17 = vld [vmem:[#allocation2 + $0x1a8] sm:$0xff] }
  0x51   :  { %1391 = vmatmul.mubr.bf16.gmra.mxu0 %v2333_v39  ;;  %1487 = vmatmul.mubr.bf16.gmra.mxu1 %v2429_v40  ;;  %v3122_v39 = vld [vmem:[#allocation5 + $0x150] sm:$0xff]  }
  0x52   :  { %2643 = vmatpush3.bf16.msra.mxu1 %v3093_v41  ;;  %1398 = vmatprep.mubr.bf16.mxu0 %v2342_v42  ;;  %v3123_v40 = vld [vmem:[#allocation5 + $0x110] sm:$0xff]   ;;  %v3124_v41 = vld [vmem:[#allocation5 + $0x148] sm:$0xff]   ;;  %v119_v42 = vld [vmem:[#allocation2 + $0x1c0] sm:$0xff] }
  0x53   :  { %2644 = vmatprep.subr.bf16.mxu1 %v3094_v43  ;;  %1494 = vmatprep.mubr.bf16.mxu1 %v2438_v44  ;;  %v123_v43 = vld [vmem:[#allocation2 + $0x1e0] sm:$0xff]  ;;  %v88_v44 = vld [vmem:[#allocation2 + $0xc8] sm:$0xff] }
  0x54   :  { %2754 = vmatprep.subr.bf16.mxu0 %v3114_v10  ;;  %v2381_v63 = vcombine.low %v119_v42, %v123_v43 }
  0x55   :  { %2755 = vmatpush3.bf16.msra.mxu0 %v3115_v11 }
  0x56   :  { %2645 = vmatpush3.bf16.msra.mxu1 %v3095_v45  ;;  %2756 = vmatprep.subr.bf16.mxu0 %v3116_v14  ;;  %v92_v45 = vld [vmem:[#allocation2 + $0xe8] sm:$0xff]  ;;  %v143_v14 = vld [vmem:[#allocation2 + $0x280] sm:$0xff] }
  0x57   :  { %2646 = vmatprep.subr.bf16.mxu1 %v3096_v46  ;;  %v3121_v46 = vld [vmem:[#allocation5 + $0x1a0] sm:$0xff]   ;;  %v2351_v0 = vcombine.low %v88_v44, %v92_v45  ;;  %v2405_v26 = vcombine.low %v143_v14, %v147_v15 }
  0x59   :  { %1399 = vmatmul.mubr.bf16.gmra.mxu0 %v2341_v51  ;;  %1495 = vmatmul.mubr.bf16.gmra.mxu1 %v2437_v52  ;;  %v2382_v51 = vcombine.high %v119_v42, %v123_v43  ;;  %v2352_v52 = vcombine.high %v88_v44, %v92_v45 }
  0x5a   :  { %2647 = vmatpush3.bf16.msra.mxu1 %v3097_v53  ;;  %1406 = vmatprep.mubr.bf16.mxu0 %v2350_v54  ;;  %v3126_v53 = vld [vmem:[#allocation5 + $0x140] sm:$0xff]   ;;  %v3129_v54 = vld [vmem:[#allocation5 + $0x198] sm:$0xff]  }
  0x5b   :  { %2648 = vmatprep.subr.bf16.mxu1 %v3098_v56  ;;  %1502 = vmatprep.mubr.bf16.mxu1 %v2446_v57  ;;  %v3130_v56 = vld [vmem:[#allocation5 + $0x1d0] sm:$0xff]   ;;  %v127_v57 = vld [vmem:[#allocation2 + $0x200] sm:$0xff] }
  0x5c   :  { %2757 = vmatpush3.bf16.msra.mxu0 %v3117_v24  ;;  %v120_v24 = vld [vmem:[#allocation2 + $0x1c8] sm:$0xff] }
  0x5d   :  { %2758 = vmatprep.subr.bf16.mxu0 %v3118_v27  ;;  %v2375_v27 = vcombine.low %v112_v16, %v116_v17  ;;  %v2384_v29 = vcombine.high %v120_v24, %v124_v25 }
  0x5e   :  { %2649 = vmatpush3.bf16.msra.mxu1 %v3099_v58  ;;  %v131_v58 = vld [vmem:[#allocation2 + $0x220] sm:$0xff] }
  0x5f   :  { %2650 = vmatprep.subr.bf16.mxu1 %v3100_v60  ;;  %v100_v60 = vld [vmem:[#allocation2 + $0x128] sm:$0xff]  ;;  %v2390_v1 = vcombine.high %v127_v57, %v131_v58  ;;  %v2389_v10 = vcombine.low %v127_v57, %v131_v58  ;;  %v93_v57 = vld [vmem:[#allocation2 + $0xf0] sm:$0xff] }
  0x60   :  { %2759 = vmatpush3.bf16.msra.mxu0 %v3120_v32  ;;  %v2360_v2 = vcombine.high %v96_v59, %v100_v60  ;;  %v2359_v11 = vcombine.low %v96_v59, %v100_v60  ;;  %v65_v32 = vld [vmem:[#allocation2 + $0x10] sm:$0xff] }
  0x61   :  { %1407 = vmatmul.mubr.bf16.gmra.mxu0 %v2349_v3  ;;  %1503 = vmatmul.mubr.bf16.gmra.mxu1 %v2445_v4  ;;  %v3133_v3 = vld [vmem:[#allocation5 + $0x188] sm:$0xff]   ;;  %v3134_v4 = vld [vmem:[#allocation5 + $0x1c0] sm:$0xff]  }
  0x62   :  { %2651 = vmatpush3.bf16.msra.mxu1 %v3101_v5  ;;  %1414 = vmatprep.mubr.bf16.mxu0 %v2358_v6  ;;  %v135_v5 = vld [vmem:[#allocation2 + $0x240] sm:$0xff] }
  0x63   :  { %2652 = vmatprep.subr.bf16.mxu1 %v3102_v7  ;;  %1543 = vmatprep.mubr.bf16.mxu1 %v2328_v8  ;;  %v139_v6 = vld [vmem:[#allocation2 + $0x260] sm:$0xff]  ;;  %v104_v7 = vld [vmem:[#allocation2 + $0x148] sm:$0xff] }
  0x64   :  { %2760 = vmatprep.subr.bf16.mxu0 %v3122_v39  ;;  %v108_v8 = vld [vmem:[#allocation2 + $0x168] sm:$0xff] }
  0x65   :  { %2761 = vmatpush3.bf16.msra.mxu0 %v3123_v40  ;;  %v2368_v13 = vcombine.high %v104_v7, %v108_v8  ;;  %v140_v39 = vld [vmem:[#allocation2 + $0x268] sm:$0xff]  ;;  %v73_v40 = vld [vmem:[#allocation2 + $0x50] sm:$0xff] }
  0x66   :  { %2653 = vmatpush3.bf16.msra.mxu1 %v3103_v9  ;;  %2762 = vmatprep.subr.bf16.mxu0 %v3124_v41  ;;  %v3135_v9 = vld [vmem:[#allocation5 + $0x180] sm:$0xff]   ;;  %v77_v41 = vld [vmem:[#allocation2 + $0x70] sm:$0xff] }
  0x67   :  { %2862 = vmatprep.subr.bf16.mxu1 %v3104_v12  ;;  %v2398_v12 = vcombine.high %v135_v5, %v139_v6  ;;  %v2338_v45 = vcombine.high %v73_v40, %v77_v41 }
  0x69   :  { %1415 = vmatmul.mubr.bf16.gmra.mxu0 %v2357_v19  ;;  %1544 = vmatmul.mubr.bf16.vlgmr.msra.gmra.mxu1 %v2327_v18  ;;  %v2397_v18 = vcombine.low %v135_v5, %v139_v6  ;;  %v2367_v19 = vcombine.low %v104_v7, %v108_v8  ;;  %v168_v6 = vld [vmem:[#allocation2 + $0x348] sm:$0xff]  ;;  %v105_v8 = vld [vmem:[#allocation2 + $0x150] sm:$0xff] }
  0x6a   :  { %2863 = vmatpush3.bf16.msra.mxu1 %v3105_v20  ;;  %1422 = vmatprep.mubr.bf16.mxu0 %v2366_v21  ;;  %v2406_v20 = vcombine.high %v143_v14, %v147_v15  ;;  %v2376_v21 = vcombine.high %v112_v16, %v116_v17  ;;  %v172_v7 = vld [vmem:[#allocation2 + $0x368] sm:$0xff]  ;;  %v113_v16 = vld [vmem:[#allocation2 + $0x190] sm:$0xff] }
  0x6b   :  { %1551 = vmatprep.mubr.bf16.mxu1 %v2336_v22  ;;  %2864 = vmatprep.subr.bf16.mxu1 %v3106_v23  ;;  %v151_v22 = vld [vmem:[#allocation2 + $0x2c0] sm:$0xff]  ;;  %v176_v14 = vld [vmem:[#allocation2 + $0x388] sm:$0xff]  ;;  %v117_v17 = vld [vmem:[#allocation2 + $0x1b0] sm:$0xff] }
  0x6c   :  { %2763 = vmatpush3.bf16.msra.mxu0 %v3125_v47  ;;  %v155_v23 = vld [vmem:[#allocation2 + $0x2e0] sm:$0xff]  ;;  %v148_v47 = vld [vmem:[#allocation2 + $0x2a8] sm:$0xff] }
  0x6d   :  { %2764 = vmatprep.subr.bf16.mxu0 %v3126_v53  ;;  %v2414_v28 = vcombine.high %v151_v22, %v155_v23  ;;  %v180_v15 = vld [vmem:[#allocation2 + $0x3a8] sm:$0xff] }
  0x6e   :  { %2865 = vmatpush3.bf16.msra.mxu1 %v3107_v30  ;;  %v128_v30 = vld [vmem:[#allocation2 + $0x208] sm:$0xff] }
  0x6f   :  { %2866 = vmatprep.subr.bf16.mxu1 %v3110_v31  ;;  %v132_v31 = vld [vmem:[#allocation2 + $0x228] sm:$0xff] }
  0x70   :  { %2765 = vmatpush3.bf16.msra.mxu0 %v3127_v55  ;;  %v2391_v43 = vcombine.low %v128_v30, %v132_v31  ;;  %v156_v55 = vld [vmem:[#allocation2 + $0x2e8] sm:$0xff] }
  0x71   :  { %1423 = vmatmul.mubr.bf16.gmra.mxu0 %v2365_v33  ;;  %1552 = vmatmul.mubr.bf16.gmra.mxu1 %v2335_v34  ;;  %v69_v33 = vld [vmem:[#allocation2 + $0x30] sm:$0xff]  ;;  %v2413_v34 = vcombine.low %v151_v22, %v155_v23  ;;  %v184_v22 = vld [vmem:[#allocation2 + $0x3c8] sm:$0xff] }
  0x72   :  { %1430 = vmatprep.mubr.bf16.mxu0 %v2374_v35  ;;  %1559 = vmatprep.mubr.bf16.mxu1 %v2344_v36  ;;  %v2383_v35 = vcombine.low %v120_v24, %v124_v25  ;;  %v2392_v36 = vcombine.high %v128_v30, %v132_v31  ;;  %v2329_v42 = vcombine.low %v65_v32, %v69_v33  ;;  %v188_v23 = vld [vmem:[#allocation2 + $0x3e8] sm:$0xff]  ;;  %v121_v24 = vld [vmem:[#allocation2 + $0x1d0] sm:$0xff] }
  0x73   :  { %2867 = vmatpush3.bf16.msra.mxu1 %v3111_v37  ;;  %v2330_v37 = vcombine.high %v65_v32, %v69_v33  ;;  %v125_v25 = vld [vmem:[#allocation2 + $0x1f0] sm:$0xff]  ;;  %v66_v32 = vld [vmem:[#allocation2 + $0x18] sm:$0xff] }
  0x74   :  { %2868 = vmatprep.subr.bf16.mxu1 %v3119_v38  ;;  %v136_v38 = vld [vmem:[#allocation2 + $0x248] sm:$0xff]  ;;  %v129_v30 = vld [vmem:[#allocation2 + $0x210] sm:$0xff]  ;;  %v70_v33 = vld [vmem:[#allocation2 + $0x38] sm:$0xff] }
  0x75   :  { %v2400_v44 = vcombine.high %v136_v38, %v140_v39  ;;  %v133_v31 = vld [vmem:[#allocation2 + $0x230] sm:$0xff] }
  0x77   :  { %2869 = vmatpush3.bf16.msra.mxu1 %v3121_v46  ;;  %v144_v46 = vld [vmem:[#allocation2 + $0x288] sm:$0xff] }
  0x78   :  { %2870 = vmatprep.subr.bf16.mxu1 %v3128_v48  ;;  %v81_v48 = vld [vmem:[#allocation2 + $0x90] sm:$0xff]  ;;  %v2407_v58 = vcombine.low %v144_v46, %v148_v47 }
  0x79   :  { %1431 = vmatmul.mubr.bf16.gmra.mxu0 %v2373_v49  ;;  %1560 = vmatmul.mubr.bf16.gmra.mxu1 %v2343_v50  ;;  %v85_v49 = vld [vmem:[#allocation2 + $0xb0] sm:$0xff]  ;;  %v2399_v50 = vcombine.low %v136_v38, %v140_v39 }
  0x7a   :  { %1438 = vmatprep.mubr.bf16.mxu0 %v2382_v51  ;;  %1567 = vmatprep.mubr.bf16.mxu1 %v2352_v52  ;;  %v2337_v51 = vcombine.low %v73_v40, %v77_v41  ;;  %v2408_v52 = vcombine.high %v144_v46, %v148_v47  ;;  %v2346_v53 = vcombine.high %v81_v48, %v85_v49  ;;  %v137_v38 = vld [vmem:[#allocation2 + $0x250] sm:$0xff]  ;;  %v74_v40 = vld [vmem:[#allocation2 + $0x58] sm:$0xff] }
  0x7b   :  { %2871 = vmatpush3.bf16.msra.mxu1 %v3129_v54  ;;  %v152_v54 = vld [vmem:[#allocation2 + $0x2c8] sm:$0xff]  ;;  %v2345_v59 = vcombine.low %v81_v48, %v85_v49  ;;  %v141_v39 = vld [vmem:[#allocation2 + $0x270] sm:$0xff]  ;;  %v78_v41 = vld [vmem:[#allocation2 + $0x78] sm:$0xff] }
  0x7c   :  { %2872 = vmatprep.subr.bf16.mxu1 %v3130_v56  ;;  %v89_v56 = vld [vmem:[#allocation2 + $0xd0] sm:$0xff]  ;;  %v2416_v60 = vcombine.high %v152_v54, %v156_v55  ;;  %v82_v48 = vld [vmem:[#allocation2 + $0x98] sm:$0xff] }
  0x7d   :  { %v145_v46 = vld [vmem:[#allocation2 + $0x290] sm:$0xff]  ;;  %v86_v49 = vld [vmem:[#allocation2 + $0xb8] sm:$0xff] }
  0x7e   :  { %v149_v47 = vld [vmem:[#allocation2 + $0x2b0] sm:$0xff] }
  0x7f   :  { %2873 = vmatpush3.bf16.msra.mxu1 %v3131_v61  ;;  %v2354_v61 = vcombine.high %v89_v56, %v93_v57 }
  0x80   :  { %2874 = vmatprep.subr.bf16.mxu1 %v3132_v62  ;;  %v160_v62 = vld [vmem:[#allocation2 + $0x308] sm:$0xff] }
  0x81   :  { %1439 = vmatmul.mubr.bf16.gmra.mxu0 %v2381_v63  ;;  %1568 = vmatmul.mubr.bf16.gmra.mxu1 %v2351_v0  ;;  %v164_v63 = vld [vmem:[#allocation2 + $0x328] sm:$0xff]  ;;  %v97_v0 = vld [vmem:[#allocation2 + $0x110] sm:$0xff] }
  0x82   :  { %1446 = vmatprep.mubr.bf16.mxu0 %v2390_v1  ;;  %1575 = vmatprep.mubr.bf16.mxu1 %v2360_v2  ;;  %v101_v1 = vld [vmem:[#allocation2 + $0x130] sm:$0xff]  ;;  %v2415_v2 = vcombine.low %v152_v54, %v156_v55 }
  0x83   :  { %2875 = vmatpush3.bf16.msra.mxu1 %v3133_v3  ;;  %v2353_v3 = vcombine.low %v89_v56, %v93_v57  ;;  %v2362_v5 = vcombine.high %v97_v0, %v101_v1  ;;  %v153_v54 = vld [vmem:[#allocation2 + $0x2d0] sm:$0xff]  ;;  %v90_v56 = vld [vmem:[#allocation2 + $0xd8] sm:$0xff] }
  0x84   :  { %2876 = vmatprep.subr.bf16.mxu1 %v3134_v4  ;;  %v2424_v4 = vcombine.high %v160_v62, %v164_v63  ;;  %v157_v55 = vld [vmem:[#allocation2 + $0x2f0] sm:$0xff]  ;;  %v94_v57 = vld [vmem:[#allocation2 + $0xf8] sm:$0xff] }
  0x87   :  { %2877 = vmatpush3.bf16.msra.mxu1 %v3135_v9  ;;  %v109_v9 = vld [vmem:[#allocation2 + $0x170] sm:$0xff] }
  0x89   :  { %1447 = vmatmul.mubr.bf16.gmra.mxu0 %v2389_v10  ;;  %1576 = vmatmul.mubr.bf16.gmra.mxu1 %v2359_v11  ;;  %v2423_v10 = vcombine.low %v160_v62, %v164_v63  ;;  %v2361_v11 = vcombine.low %v97_v0, %v101_v1  ;;  %v161_v62 = vld [vmem:[#allocation2 + $0x310] sm:$0xff]  ;;  %v3136_v63 = vld [vmem:[#allocation7 + $0x38] sm:$0xff]  }
  0x8a   :  { %1454 = vmatprep.mubr.bf16.mxu0 %v2398_v12  ;;  %1583 = vmatprep.mubr.bf16.mxu1 %v2368_v13  ;;  %v2432_v12 = vcombine.high %v168_v6, %v172_v7  ;;  %v2370_v13 = vcombine.high %v105_v8, %v109_v9  ;;  %v165_v0 = vld [vmem:[#allocation2 + $0x330] sm:$0xff]  ;;  %v98_v1 = vld [vmem:[#allocation2 + $0x118] sm:$0xff] }
  0x8b   :  { %2998 = vmatprep.subr.bf16.mxu0 %v3136_v63 }
  0x91   :  { %1455 = vmatmul.mubr.bf16.gmra.mxu0 %v2397_v18  ;;  %1584 = vmatmul.mubr.bf16.gmra.mxu1 %v2367_v19  ;;  %v2431_v18 = vcombine.low %v168_v6, %v172_v7  ;;  %v2369_v19 = vcombine.low %v105_v8, %v109_v9  ;;  %v169_v7 = vld [vmem:[#allocation2 + $0x350] sm:$0xff]  ;;  %v106_v9 = vld [vmem:[#allocation2 + $0x158] sm:$0xff] }
  0x92   :  { %1462 = vmatprep.mubr.bf16.mxu0 %v2406_v20  ;;  %1591 = vmatprep.mubr.bf16.mxu1 %v2376_v21  ;;  %v2440_v20 = vcombine.high %v176_v14, %v180_v15  ;;  %v2378_v21 = vcombine.high %v113_v16, %v117_v17  ;;  %v173_v8 = vld [vmem:[#allocation2 + $0x370] sm:$0xff] }
  0x99   :  { %1463 = vmatmul.mubr.bf16.gmra.mxu0 %v2405_v26  ;;  %1592 = vmatmul.mubr.bf16.gmra.mxu1 %v2375_v27  ;;  %v2439_v26 = vcombine.low %v176_v14, %v180_v15  ;;  %v2377_v27 = vcombine.low %v113_v16, %v117_v17  ;;  %v177_v17 = vld [vmem:[#allocation2 + $0x390] sm:$0xff] }
  0x9a   :  { %1470 = vmatprep.mubr.bf16.mxu0 %v2414_v28  ;;  %1599 = vmatprep.mubr.bf16.mxu1 %v2384_v29  ;;  %v2448_v28 = vcombine.high %v184_v22, %v188_v23  ;;  %v2386_v29 = vcombine.high %v121_v24, %v125_v25 }
  0xa1   :  { %1471 = vmatmul.mubr.bf16.gmra.mxu0 %v2413_v34  ;;  %1600 = vmatmul.mubr.bf16.gmra.mxu1 %v2383_v35  ;;  %v2447_v34 = vcombine.low %v184_v22, %v188_v23  ;;  %v2385_v35 = vcombine.low %v121_v24, %v125_v25  ;;  %v114_v22 = vld [vmem:[#allocation2 + $0x198] sm:$0xff] }
  0xa2   :  { %1607 = vmatprep.mubr.bf16.mxu1 %v2392_v36  ;;  %1704 = vmatprep.mubr.bf16.mxu0 %v2330_v37  ;;  %v2394_v36 = vcombine.high %v129_v30, %v133_v31  ;;  %v2332_v37 = vcombine.high %v66_v32, %v70_v33  ;;  %v118_v23 = vld [vmem:[#allocation2 + $0x1b8] sm:$0xff] }
  0xa9   :  { %1608 = vmatmul.mubr.bf16.gmra.mxu1 %v2391_v43  ;;  %1705 = vmatmul.mubr.bf16.vlgmr.msra.gmra.mxu0 %v2329_v42  ;;  %v2331_v42 = vcombine.low %v66_v32, %v70_v33  ;;  %v2393_v43 = vcombine.low %v129_v30, %v133_v31  ;;  %v2380_v31 = vcombine.high %v114_v22, %v118_v23 }
  0xaa   :  { %1615 = vmatprep.mubr.bf16.mxu1 %v2400_v44  ;;  %1712 = vmatprep.mubr.bf16.mxu0 %v2338_v45  ;;  %v2402_v44 = vcombine.high %v137_v38, %v141_v39  ;;  %v2340_v45 = vcombine.high %v74_v40, %v78_v41 }
  0xab   :  { %2999 = vmatpush3.bf16.msra.mxu0 %v3136_v63 }
  0xb1   :  { %1616 = vmatmul.mubr.bf16.gmra.mxu1 %v2399_v50  ;;  %1713 = vmatmul.mubr.bf16.gmra.mxu0 %v2337_v51  ;;  %v2401_v50 = vcombine.low %v137_v38, %v141_v39  ;;  %v2339_v51 = vcombine.low %v74_v40, %v78_v41  ;;  %v189_v40 = vld [vmem:[#allocation2 + $0x3f0] sm:$0xff]  ;;  %v122_v41 = vld [vmem:[#allocation2 + $0x1d8] sm:$0xff] }
  0xb2   :  { %1623 = vmatprep.mubr.bf16.mxu1 %v2408_v52  ;;  %1720 = vmatprep.mubr.bf16.mxu0 %v2346_v53  ;;  %v2410_v52 = vcombine.high %v145_v46, %v149_v47  ;;  %v2348_v53 = vcombine.high %v82_v48, %v86_v49 }
  0xb9   :  { %1624 = vmatmul.mubr.bf16.gmra.mxu1 %v2407_v58  ;;  %1721 = vmatmul.mubr.bf16.gmra.mxu0 %v2345_v59  ;;  %v2409_v58 = vcombine.low %v145_v46, %v149_v47  ;;  %v2347_v59 = vcombine.low %v82_v48, %v86_v49  ;;  %v2379_v48 = vcombine.low %v114_v22, %v118_v23  ;;  %v3322_v22 = vld [vmem:[%s3718_s2] ss:$0 sm:$0xff] }
  0xba   :  { %1631 = vmatprep.mubr.bf16.mxu1 %v2416_v60  ;;  %1728 = vmatprep.mubr.bf16.mxu0 %v2354_v61  ;;  %v2418_v60 = vcombine.high %v153_v54, %v157_v55  ;;  %v2356_v61 = vcombine.high %v90_v56, %v94_v57 }
  0xc1   :  { %1632 = vmatmul.mubr.bf16.gmra.mxu1 %v2415_v2  ;;  %1729 = vmatmul.mubr.bf16.gmra.mxu0 %v2353_v3  ;;  %v102_v2 = vld [vmem:[#allocation2 + $0x138] sm:$0xff]  ;;  %v2417_v3 = vcombine.low %v153_v54, %v157_v55 }
  0xc2   :  { %1639 = vmatprep.mubr.bf16.mxu1 %v2424_v4  ;;  %1736 = vmatprep.mubr.bf16.mxu0 %v2362_v5  ;;  %v2355_v4 = vcombine.low %v90_v56, %v94_v57  ;;  %v2426_v5 = vcombine.high %v161_v62, %v165_v0  ;;  %v2364_v6 = vcombine.high %v98_v1, %v102_v2  ;;  %v3138_v56 = vld [vmem:[#allocation7 + $0x28] sm:$0xff]  }
  0xc9   :  { %1640 = vmatmul.mubr.bf16.gmra.mxu1 %v2423_v10  ;;  %1737 = vmatmul.mubr.bf16.gmra.mxu0 %v2361_v11  ;;  %v110_v10 = vld [vmem:[#allocation2 + $0x178] sm:$0xff]  ;;  %v2425_v11 = vcombine.low %v161_v62, %v165_v0 }
  0xca   :  { %1647 = vmatprep.mubr.bf16.mxu1 %v2432_v12  ;;  %1744 = vmatprep.mubr.bf16.mxu0 %v2370_v13  ;;  %v2363_v12 = vcombine.low %v98_v1, %v102_v2  ;;  %v2434_v13 = vcombine.high %v169_v7, %v173_v8  ;;  %v2372_v14 = vcombine.high %v106_v9, %v110_v10 }
  0xd1   :  { %1648 = vmatmul.mubr.bf16.gmra.mxu1 %v2431_v18  ;;  %1745 = vmatmul.mubr.bf16.gmra.mxu0 %v2369_v19  ;;  %v3137_v18 = vld [vmem:[#allocation7 + $0x30] sm:$0xff]  }
  0xd2   :  { %1655 = vmatprep.mubr.bf16.mxu1 %v2440_v20  ;;  %1752 = vmatprep.mubr.bf16.mxu0 %v2378_v21  ;;  %v181_v21 = vld [vmem:[#allocation2 + $0x3b0] sm:$0xff] }
  0xd3   :  { %3000 = vmatprep.subr.bf16.mxu0 %v3137_v18  ;;  %v2442_v30 = vcombine.high %v177_v17, %v181_v21  ;;  %v2441_v47 = vcombine.low %v177_v17, %v181_v21 }
  0xd4   :  { %3001 = vmatpush3.bf16.msra.mxu0 %v3137_v18 }
  0xd5   :  { %3002 = vmatprep.subr.bf16.mxu0 %v3138_v56 }
  0xd8   :  { %3003 = vmatpush3.bf16.msra.mxu0 %v3138_v56  ;;  %v3141_v56 = vld [vmem:[#allocation7 + $0x10] sm:$0xff]  }
  0xd9   :  { %1656 = vmatmul.mubr.bf16.gmra.mxu1 %v2439_v26  ;;  %1753 = vmatmul.mubr.bf16.gmra.mxu0 %v2377_v27 }
  0xda   :  { %1663 = vmatprep.mubr.bf16.mxu1 %v2448_v28  ;;  %1760 = vmatprep.mubr.bf16.mxu0 %v2386_v29  ;;  %v2433_v28 = vcombine.low %v169_v7, %v173_v8  ;;  %v2371_v29 = vcombine.low %v106_v9, %v110_v10 }
  0xe1   :  { %1664 = vmatmul.mubr.bf16.gmra.mxu1 %v2447_v34  ;;  %1761 = vmatmul.mubr.bf16.gmra.mxu0 %v2385_v35 }
  0xe2   :  { %1768 = vmatprep.mubr.bf16.mxu0 %v2394_v36  ;;  %1865 = vmatprep.mubr.bf16.mxu1 %v2332_v37  ;;  %v185_v37 = vld [vmem:[#allocation2 + $0x3d0] sm:$0xff] }
  0xe3   :  { %v2450_v49 = vcombine.high %v185_v37, %v189_v40  ;;  %v2449_v1 = vcombine.low %v185_v37, %v189_v40 }
  0xe9   :  { %1769 = vmatmul.mubr.bf16.gmra.mxu0 %v2393_v43  ;;  %1866 = vmatmul.mubr.bf16.vlgmr.msra.gmra.mxu1 %v2331_v42  ;;  %v126_v42 = vld [vmem:[#allocation2 + $0x1f8] sm:$0xff] }
  0xea   :  { %1776 = vmatprep.mubr.bf16.mxu0 %v2402_v44  ;;  %1873 = vmatprep.mubr.bf16.mxu1 %v2340_v45  ;;  %v2387_v2 = vcombine.low %v122_v41, %v126_v42 }
  0xf1   :  { %1777 = vmatmul.mubr.bf16.gmra.mxu0 %v2401_v50  ;;  %1874 = vmatmul.mubr.bf16.gmra.mxu1 %v2339_v51  ;;  %v2388_v50 = vcombine.high %v122_v41, %v126_v42 }
  0xf2   :  { %1784 = vmatprep.mubr.bf16.mxu0 %v2410_v52  ;;  %1881 = vmatprep.mubr.bf16.mxu1 %v2348_v53 }
  0xf9   :  { %1785 = vmatmul.mubr.bf16.gmra.mxu0 %v2409_v58  ;;  %1882 = vmatmul.mubr.bf16.gmra.mxu1 %v2347_v59  ;;  %v130_v59 = vld [vmem:[#allocation2 + $0x218] sm:$0xff] }
  0xfa   :  { %1792 = vmatprep.mubr.bf16.mxu0 %v2418_v60  ;;  %1889 = vmatprep.mubr.bf16.mxu1 %v2356_v61  ;;  %v134_v60 = vld [vmem:[#allocation2 + $0x238] sm:$0xff] }
  0xfb   :  { %v2395_v17 = vcombine.low %v130_v59, %v134_v60 }
 0x101   :  { %1793 = vmatmul.mubr.bf16.gmra.mxu0 %v2417_v3  ;;  %1890 = vmatmul.mubr.bf16.gmra.mxu1 %v2355_v4  ;;  %v2396_v3 = vcombine.high %v130_v59, %v134_v60  ;;  %v154_v59 = vld [vmem:[#allocation2 + $0x2d8] sm:$0xff] }
 0x102   :  { %1800 = vmatprep.mubr.bf16.mxu0 %v2426_v5  ;;  %1897 = vmatprep.mubr.bf16.mxu1 %v2364_v6  ;;  %v158_v60 = vld [vmem:[#allocation2 + $0x2f8] sm:$0xff] }
 0x109   :  { %v2542_v15 = vpop.f32.mrf.mxu0  ;;  %v2614_v16 = vpop.f32.mrf.mxu1  ;;  %1801 = vmatmul.mubr.bf16.gmra.mxu0 %v2425_v11  ;;  %1898 = vmatmul.mubr.bf16.gmra.mxu1 %v2363_v12  ;;  %v138_v11 = vld [vmem:[#allocation2 + $0x258] sm:$0xff] }
 0x10a   :  { %1808 = vmatprep.mubr.bf16.mxu0 %v2434_v13  ;;  %1905 = vmatprep.mubr.bf16.mxu1 %v2372_v14  ;;  %v142_v12 = vld [vmem:[#allocation2 + $0x278] sm:$0xff] }
 0x10b   :  { %v2543_v19 = vpop.f32.mrf.mxu0  ;;  %v2615_v20 = vpop.f32.mrf.mxu1  ;;  %v2404_v18 = vcombine.high %v138_v11, %v142_v12  ;;  %v2403_v41 = vcombine.low %v138_v11, %v142_v12 }
 0x10c   :  { %v3279_v24 = vadd.f32 %v2543_v19, %v2542_v15  ;;  %v3281_v25 = vadd.f32 %v2615_v20, %v2614_v16 }
 0x10d   :  { %v3283_v26 = vpop.f32.mrf.mxu0  ;;  %v2617_v27 = vpop.f32.mrf.mxu1 }
 0x10f   :  { %v3285_v32 = vpop.f32.mrf.mxu0  ;;  %v2618_v33 = vpop.f32.mrf.mxu1 }
 0x110   :  { %v3287_v34 = vadd.f32 %v2618_v33, %v2617_v27 }
 0x111   :  { %v2548_v35 = vpop.f32.mrf.mxu0  ;;  %v2620_v36 = vpop.f32.mrf.mxu1  ;;  %1809 = vmatmul.mubr.bf16.gmra.mxu0 %v2433_v28  ;;  %1906 = vmatmul.mubr.bf16.gmra.mxu1 %v2371_v29  ;;  %v1385_v28 = vadd.f32 %v3279_v24, %v3322_v22  ;;  %v2547_v29 = vadd.f32 %v3285_v32, %v3283_v26  ;;  %v3140_v32 = vld [vmem:[#allocation7 + $0x18] sm:$0xff]  }
 0x112   :  { %1816 = vmatprep.mubr.bf16.mxu0 %v2442_v30  ;;  %1913 = vmatprep.mubr.bf16.mxu1 %v2380_v31  ;;  %v3139_v30 = vld [vmem:[#allocation7 + $0x20] sm:$0xff]  }
 0x113   :  { %v2549_v38 = vpop.f32.mrf.mxu0  ;;  %v2621_v39 = vpop.f32.mrf.mxu1  ;;  %3004 = vmatprep.subr.bf16.mxu0 %v3139_v30  ;;  %v1388_v24 = vadd.f32 %v2547_v29, %v3322_v22  ;;  %v166_v29 = vld [vmem:[#allocation2 + $0x338] sm:$0xff] }
 0x114   :  { %v3289_v43 = vadd.f32 %v2549_v38, %v2548_v35  ;;  %v3291_v44 = vadd.f32 %v2621_v39, %v2620_v36  ;;  %v146_v35 = vld [vmem:[#allocation2 + $0x298] sm:$0xff]  ;;  %3005 = vmatpush3.bf16.msra.mxu0 %v3139_v30 }
 0x115   :  { %v3293_v45 = vpop.f32.mrf.mxu0  ;;  %v2623_v46 = vpop.f32.mrf.mxu1  ;;  %v150_v36 = vld [vmem:[#allocation2 + $0x2b8] sm:$0xff]  ;;  %3006 = vmatprep.subr.bf16.mxu0 %v3140_v32 }
 0x116   :  { %v2412_v26 = vcombine.high %v146_v35, %v150_v36 }
 0x117   :  { %v3295_v51 = vpop.f32.mrf.mxu0  ;;  %v2624_v52 = vpop.f32.mrf.mxu1 }
 0x118   :  { %v3297_v53 = vadd.f32 %v2624_v52, %v2623_v46  ;;  %3007 = vmatpush3.bf16.msra.mxu0 %v3140_v32  ;;  %v1393_v52 = vadd.f32 %v3289_v43, %v3322_v22 }
 0x119   :  { %v2554_v54 = vpop.f32.mrf.mxu0  ;;  %v2626_v55 = vpop.f32.mrf.mxu1  ;;  %1817 = vmatmul.mubr.bf16.gmra.mxu0 %v2441_v47  ;;  %1914 = vmatmul.mubr.bf16.gmra.mxu1 %v2379_v48 }
 0x11a   :  { %1824 = vmatprep.mubr.bf16.mxu0 %v2450_v49  ;;  %1921 = vmatprep.mubr.bf16.mxu1 %v2388_v50 }
 0x11b   :  { %v2555_v57 = vpop.f32.mrf.mxu0  ;;  %v2627_v58 = vpop.f32.mrf.mxu1  ;;  %3008 = vmatprep.subr.bf16.mxu0 %v3141_v56 }
 0x11c   :  { %v3299_v61 = vadd.f32 %v2555_v57, %v2554_v54  ;;  %v3301_v62 = vadd.f32 %v2627_v58, %v2626_v55  ;;  %v2553_v54 = vadd.f32 %v3295_v51, %v3293_v45  ;;  %3009 = vmatpush3.bf16.msra.mxu0 %v3141_v56  ;;  %v2420_v51 = vcombine.high %v154_v59, %v158_v60 }
 0x11d   :  { %v3303_v63 = vpop.f32.mrf.mxu0  ;;  %v2629_v0 = vpop.f32.mrf.mxu1 }
 0x11e   :  { %v1396_v43 = vadd.f32 %v2553_v54, %v3322_v22  ;;  %v174_v54 = vld [vmem:[#allocation2 + $0x378] sm:$0xff] }
 0x11f   :  { %v3305_v4 = vpop.f32.mrf.mxu0  ;;  %v2630_v5 = vpop.f32.mrf.mxu1 }
 0x120   :  { %v3307_v6 = vadd.f32 %v2630_v5, %v2629_v0  ;;  %v2411_v5 = vcombine.low %v146_v35, %v150_v36  ;;  %v2419_v36 = vcombine.low %v154_v59, %v158_v60 }
 0x121   :  { %v2560_v7 = vpop.f32.mrf.mxu0  ;;  %v2632_v8 = vpop.f32.mrf.mxu1  ;;  %1825 = vmatmul.mubr.bf16.gmra.mxu0 %v2449_v1  ;;  %1922 = vmatmul.mubr.bf16.gmra.mxu1 %v2387_v2 }
 0x122   :  { %1929 = vmatprep.mubr.bf16.mxu1 %v2396_v3 }
 0x123   :  { %v2561_v9 = vpop.f32.mrf.mxu0  ;;  %v2633_v10 = vpop.f32.mrf.mxu1 }
 0x124   :  { %v3309_v13 = vadd.f32 %v2561_v9, %v2560_v7  ;;  %v3311_v14 = vadd.f32 %v2633_v10, %v2632_v8  ;;  %v3142_v7 = vld [vmem:[#allocation7 + $0x8] sm:$0xff]  }
 0x125   :  { %v3313_v15 = vpop.f32.mrf.mxu0  ;;  %v2635_v16 = vpop.f32.mrf.mxu1  ;;  %3010 = vmatprep.subr.bf16.mxu0 %v3142_v7 }
 0x126   :  { %3011 = vmatpush3.bf16.msra.mxu0 %v3142_v7  ;;  %v1409_v32 = vadd.f32 %v3309_v13, %v3322_v22 }
 0x127   :  { %v3315_v19 = vpop.f32.mrf.mxu0  ;;  %v2636_v20 = vpop.f32.mrf.mxu1 }
 0x128   :  { %v3317_v21 = vadd.f32 %v2636_v20, %v2635_v16  ;;  %v1401_v16 = vadd.f32 %v3299_v61, %v3322_v22  ;;  %v3143_v20 = vld [vmem:[#allocation7] sm:$0xff]  }
 0x129   :  { %v2566_v23 = vpop.f32.mrf.mxu0  ;;  %v2654_v27 = vpop.f32.mrf.mxu1  ;;  %1930 = vmatmul.mubr.bf16.gmra.mxu1 %v2395_v17  ;;  %v2559_v17 = vadd.f32 %v3305_v4, %v3303_v63  ;;  %3012 = vmatprep.subr.bf16.mxu0 %v3143_v20 }
 0x12a   :  { %1937 = vmatprep.mubr.bf16.mxu1 %v2404_v18  ;;  %3013 = vmatpush3.bf16.msra.mxu0 %v3143_v20 }
 0x12b   :  { %v2567_v31 = vpop.f32.mrf.mxu0  ;;  %v2655_v33 = vpop.f32.mrf.mxu1  ;;  %v1404_v61 = vadd.f32 %v2559_v17, %v3322_v22  ;;  %v182_v17 = vld [vmem:[#allocation2 + $0x3b8] sm:$0xff] }
 0x12c   :  { %v3328_v37 = vadd.f32 %v2567_v31, %v2566_v23  ;;  %v2656_v38 = vadd.f32 %v2655_v33, %v2654_v27 }
 0x12d   :  { %v3330_v39 = vpop.f32.mrf.mxu0  ;;  %v2657_v40 = vpop.f32.mrf.mxu1 }
 0x12e   :  { %v3333_v42 = vadd.f32 %v2656_v38, %v1385_v28  ;;  %v162_v28 = vld [vmem:[#allocation2 + $0x318] sm:$0xff]  ;;  %v1417_v7 = vadd.f32 %v3328_v37, %v3322_v22 }
 0x12f   :  { %v3335_v46 = vpop.f32.mrf.mxu0  ;;  %v2658_v47 = vpop.f32.mrf.mxu1  ;;  %v2428_v4 = vcombine.high %v162_v28, %v166_v29  ;;  %v2427_v60 = vcombine.low %v162_v28, %v166_v29 }
 0x130   :  { %v2659_v48 = vadd.f32 %v2658_v47, %v2657_v40  ;;  %v2565_v47 = vadd.f32 %v3315_v19, %v3313_v15 }
 0x131   :  { %v2572_v49 = vpop.f32.mrf.mxu0  ;;  %v2660_v50 = vpop.f32.mrf.mxu1  ;;  %1938 = vmatmul.mubr.bf16.gmra.mxu1 %v2403_v41 }
 0x132   :  { %v3341_v55 = vadd.f32 %v2659_v48, %v1388_v24  ;;  %1945 = vmatprep.mubr.bf16.mxu1 %v2412_v26 }
 0x133   :  { %v2573_v57 = vpop.f32.mrf.mxu0  ;;  %v2661_v58 = vpop.f32.mrf.mxu1 }
 0x134   :  { %v3343_v0 = vadd.f32 %v2573_v57, %v2572_v49  ;;  %v2662_v1 = vadd.f32 %v2661_v58, %v2660_v50 }
 0x135   :  { %v3345_v2 = vpop.f32.mrf.mxu0  ;;  %v2663_v3 = vpop.f32.mrf.mxu1 }
 0x136   :  { %v3348_v45 = vadd.f32 %v2662_v1, %v1393_v52  ;;  %v170_v52 = vld [vmem:[#allocation2 + $0x358] sm:$0xff]  ;;  %v1412_v1 = vadd.f32 %v2565_v47, %v3322_v22 }
 0x137   :  { %v3350_v8 = vpop.f32.mrf.mxu0  ;;  %v2664_v9 = vpop.f32.mrf.mxu1  ;;  %v2435_v29 = vcombine.low %v170_v52, %v174_v54 }
 0x138   :  { %v2665_v10 = vadd.f32 %v2664_v9, %v2663_v3  ;;  %v2436_v3 = vcombine.high %v170_v52, %v174_v54  ;;  %v2571_v9 = vadd.f32 %v3335_v46, %v3330_v39 }
 0x139   :  { %v2578_v11 = vpop.f32.mrf.mxu0  ;;  %v2666_v12 = vpop.f32.mrf.mxu1  ;;  %1946 = vmatmul.mubr.bf16.gmra.mxu1 %v2411_v5 }
 0x13a   :  { %v3356_v18 = vadd.f32 %v2665_v10, %v1396_v43  ;;  %1953 = vmatprep.mubr.bf16.mxu1 %v2420_v51 }
 0x13b   :  { %v2579_v23 = vpop.f32.mrf.mxu0  ;;  %v2667_v27 = vpop.f32.mrf.mxu1 }
 0x13c   :  { %v3358_v30 = vadd.f32 %v2579_v23, %v2578_v11  ;;  %v2668_v31 = vadd.f32 %v2667_v27, %v2666_v12 }
 0x13d   :  { %v3360_v33 = vpop.f32.mrf.mxu0  ;;  %v2669_v35 = vpop.f32.mrf.mxu1 }
 0x13e   :  { %v3363_v63 = vadd.f32 %v2668_v31, %v1401_v16  ;;  %v178_v16 = vld [vmem:[#allocation2 + $0x398] sm:$0xff]  ;;  %v1420_v31 = vadd.f32 %v2571_v9, %v3322_v22 }
 0x13f   :  { %v3365_v38 = vpop.f32.mrf.mxu0  ;;  %v2670_v40 = vpop.f32.mrf.mxu1  ;;  %v2444_v37 = vcombine.high %v178_v16, %v182_v17 }
 0x140   :  { %v2671_v41 = vadd.f32 %v2670_v40, %v2669_v35  ;;  %v2583_v9 = vadd.f32 %v3365_v38, %v3360_v33 }
 0x141   :  { %v2584_v24 = vpop.f32.mrf.mxu0  ;;  %v2672_v26 = vpop.f32.mrf.mxu1  ;;  %1954 = vmatmul.mubr.bf16.gmra.mxu1 %v2419_v36 }
 0x142   :  { %v3371_v48 = vadd.f32 %v2671_v41, %v1404_v61  ;;  %1961 = vmatprep.mubr.bf16.mxu1 %v2428_v4  ;;  %v1425_v41 = vadd.f32 %v3343_v0, %v3322_v22 }
 0x143   :  { %v2585_v49 = vpop.f32.mrf.mxu0  ;;  %v2673_v50 = vpop.f32.mrf.mxu1 }
 0x144   :  { %v3373_v56 = vadd.f32 %v2585_v49, %v2584_v24  ;;  %v2674_v57 = vadd.f32 %v2673_v50, %v2672_v26  ;;  %v2577_v24 = vadd.f32 %v3350_v8, %v3345_v2  ;;  %v186_v49 = vld [vmem:[#allocation2 + $0x3d8] sm:$0xff] }
 0x145   :  { %v3375_v58 = vpop.f32.mrf.mxu0  ;;  %v2675_v59 = vpop.f32.mrf.mxu1  ;;  %v190_v50 = vld [vmem:[#allocation2 + $0x3f8] sm:$0xff] }
 0x146   :  { %v3378_v13 = vadd.f32 %v2674_v57, %v1409_v32  ;;  %v2452_v0 = vcombine.high %v186_v49, %v190_v50  ;;  %v1441_v38 = vadd.f32 %v3373_v56, %v3322_v22 }
 0x147   :  { %v3380_v15 = vpop.f32.mrf.mxu0  ;;  %v2676_v19 = vpop.f32.mrf.mxu1 }
 0x148   :  { %v2677_v5 = vadd.f32 %v2676_v19, %v2675_v59 }
 0x149   :  { %v2590_v43 = vpop.f32.mrf.mxu0  ;;  %v2678_v51 = vpop.f32.mrf.mxu1  ;;  %1962 = vmatmul.mubr.bf16.gmra.mxu1 %v2427_v60  ;;  %v2443_v60 = vcombine.low %v178_v16, %v182_v17 }
 0x14a   :  { %v3386_v10 = vadd.f32 %v2677_v5, %v1412_v1  ;;  %1969 = vmatprep.mubr.bf16.mxu1 %v2436_v3  ;;  %v1428_v1 = vadd.f32 %v2577_v24, %v3322_v22 }
 0x14b   :  { %v2591_v11 = vpop.f32.mrf.mxu0  ;;  %v2679_v12 = vpop.f32.mrf.mxu1 }
 0x14c   :  { %v3388_v20 = vadd.f32 %v2591_v11, %v2590_v43  ;;  %v2680_v23 = vadd.f32 %v2679_v12, %v2678_v51 }
 0x14d   :  { %v2593_v27 = vpop.f32.mrf.mxu0  ;;  %v2681_v28 = vpop.f32.mrf.mxu1 }
 0x14e   :  { %v3391_v35 = vadd.f32 %v2680_v23, %v1417_v7  ;;  %v1433_v7 = vadd.f32 %v3358_v30, %v3322_v22 }
 0x14f   :  { %v2594_v36 = vpop.f32.mrf.mxu0  ;;  %v2682_v39 = vpop.f32.mrf.mxu1 }
 0x150   :  { %v3393_v46 = vadd.f32 %v2594_v36, %v2593_v27  ;;  %v2683_v61 = vadd.f32 %v2682_v39, %v2681_v28 }
 0x151   :  { %v2596_v4 = vpop.f32.mrf.mxu0  ;;  %v2684_v40 = vpop.f32.mrf.mxu1  ;;  %1970 = vmatmul.mubr.bf16.gmra.mxu1 %v2435_v29  ;;  %v2451_v29 = vcombine.low %v186_v49, %v190_v50 }
 0x152   :  { %v3399_v26 = vadd.f32 %v2683_v61, %v1420_v31  ;;  %1977 = vmatprep.mubr.bf16.mxu1 %v2444_v37  ;;  %v1436_v31 = vadd.f32 %v2583_v9, %v3322_v22 }
 0x153   :  { %v2597_v32 = vpop.f32.mrf.mxu0  ;;  %v2685_v47 = vpop.f32.mrf.mxu1 }
 0x154   :  { %v3401_v52 = vadd.f32 %v2597_v32, %v2596_v4  ;;  %v2686_v54 = vadd.f32 %v2685_v47, %v2684_v40  ;;  %v2589_v40 = vadd.f32 %v3380_v15, %v3375_v58  ;;  %v1449_v58 = vadd.f32 %v3388_v20, %v3322_v22 }
 0x155   :  { %v2599_v57 = vpop.f32.mrf.mxu0  ;;  %v2687_v59 = vpop.f32.mrf.mxu1 }
 0x156   :  { %v3404_v3 = vadd.f32 %v2686_v54, %v1425_v41 }
 0x157   :  { %v2600_v19 = vpop.f32.mrf.mxu0  ;;  %v2688_v2 = vpop.f32.mrf.mxu1 }
 0x158   :  { %v3406_v8 = vadd.f32 %v2600_v19, %v2599_v57  ;;  %v2689_v5 = vadd.f32 %v2688_v2, %v2687_v59  ;;  %v1444_v57 = vadd.f32 %v2589_v40, %v3322_v22 }
 0x159   :  { %v2602_v43 = vpop.f32.mrf.mxu0  ;;  %v2690_v51 = vpop.f32.mrf.mxu1  ;;  %1978 = vmatmul.mubr.bf16.gmra.mxu1 %v2443_v60 }
 0x15a   :  { %v3412_v11 = vadd.f32 %v2689_v5, %v1428_v1  ;;  %1985 = vmatprep.mubr.bf16.mxu1 %v2452_v0 }
 0x15b   :  { %v2603_v12 = vpop.f32.mrf.mxu0  ;;  %v2691_v16 = vpop.f32.mrf.mxu1 }
 0x15c   :  { %v2604_v17 = vadd.f32 %v2603_v12, %v2602_v43  ;;  %v2692_v23 = vadd.f32 %v2691_v16, %v2690_v51  ;;  %v1452_v12 = vadd.f32 %v3393_v46, %v3322_v22 }
 0x15d   :  { %v2605_v27 = vpop.f32.mrf.mxu0  ;;  %v2693_v28 = vpop.f32.mrf.mxu1 }
 0x15e   :  { %v3415_v37 = vadd.f32 %v2692_v23, %v1433_v7 }
 0x15f   :  { %v2606_v36 = vpop.f32.mrf.mxu0  ;;  %v2694_v39 = vpop.f32.mrf.mxu1 }
 0x160   :  { %v2607_v30 = vadd.f32 %v2606_v36, %v2605_v27  ;;  %v2695_v61 = vadd.f32 %v2694_v39, %v2693_v28 }
 0x161   :  { %v2608_v4 = vpop.f32.mrf.mxu0  ;;  %v2696_v33 = vpop.f32.mrf.mxu1  ;;  %1986 = vmatmul.mubr.bf16.gmra.mxu1 %v2451_v29 }
 0x162   :  { %v3421_v41 = vadd.f32 %v2695_v61, %v1436_v31  ;;  %v1457_v31 = vadd.f32 %v3401_v52, %v3322_v22 }
 0x163   :  { %v2609_v24 = vpop.f32.mrf.mxu0  ;;  %v2697_v32 = vpop.f32.mrf.mxu1 }
 0x164   :  { %v2610_v47 = vadd.f32 %v2609_v24, %v2608_v4  ;;  %v2698_v49 = vadd.f32 %v2697_v32, %v2696_v33 }
 0x165   :  { %v2611_v50 = vpop.f32.mrf.mxu0  ;;  %v2699_v54 = vpop.f32.mrf.mxu1 }
 0x166   :  { %v3424_v59 = vadd.f32 %v2698_v49, %v1441_v38  ;;  %v1460_v38 = vadd.f32 %v3406_v8, %v3322_v22  ;;  %v1468_v8 = vadd.f32 %v2607_v30, %v3322_v22 }
 0x167   :  { %v2612_v60 = vpop.f32.mrf.mxu0  ;;  %v2700_v1 = vpop.f32.mrf.mxu1 }
 0x168   :  { %v2613_v0 = vadd.f32 %v2612_v60, %v2611_v50  ;;  %v2701_v19 = vadd.f32 %v2700_v1, %v2699_v54  ;;  %v1465_v54 = vadd.f32 %v2604_v17, %v3322_v22  ;;  %v1473_v17 = vadd.f32 %v2610_v47, %v3322_v22 }
 0x169   :  { %v2702_v56 = vpop.f32.mrf.mxu1  ;;  %v3426_v2 = vpop.f32.mrf.mxu0 }
 0x16a   :  { %v3430_v15 = vadd.f32 %v2701_v19, %v1444_v57  ;;  %v1476_v30 = vadd.f32 %v2613_v0, %v3322_v22 }
 0x16b   :  { %v2703_v5 = vpop.f32.mrf.mxu1  ;;  %v3432_v43 = vpop.f32.mrf.mxu0 }
 0x16c   :  { %v2704_v51 = vadd.f32 %v2703_v5, %v2702_v56 }
 0x16d   :  { %v2705_v7 = vpop.f32.mrf.mxu1  ;;  %v3434_v9 = vpop.f32.mrf.mxu0 }
 0x16e   :  { %v3438_v16 = vadd.f32 %v2704_v51, %v1449_v58 }
 0x16f   :  { %v2706_v23 = vpop.f32.mrf.mxu1  ;;  %v3440_v27 = vpop.f32.mrf.mxu0 }
 0x170   :  { %3722 = vst [vmem:[#allocation12_spill] sm:$0xff] %v3438_v16  ;;  %v2707_v28 = vadd.f32 %v2706_v23, %v2705_v7 }
 0x171   :  { %v2708_v29 = vpop.f32.mrf.mxu1  ;;  %v3442_v20 = vpop.f32.mrf.mxu0 }
 0x172   :  { %v3446_v36 = vadd.f32 %v2707_v28, %v1452_v12 }
 0x173   :  { %v2709_v39 = vpop.f32.mrf.mxu1  ;;  %v3448_v61 = vpop.f32.mrf.mxu0 }
 0x174   :  { %3723 = vst [vmem:[#allocation13_spill] sm:$0xff] %v3446_v36  ;;  %v2710_v4 = vadd.f32 %v2709_v39, %v2708_v29 }
 0x175   :  { %v2711_v33 = vpop.f32.mrf.mxu1  ;;  %v3450_v46 = vpop.f32.mrf.mxu0 }
 0x176   :  { %v3454_v40 = vadd.f32 %v2710_v4, %v1457_v31 }
 0x177   :  { %v2712_v24 = vpop.f32.mrf.mxu1  ;;  %v3456_v32 = vpop.f32.mrf.mxu0 }
 0x178   :  { %3724 = vst [vmem:[#allocation14_spill] sm:$0xff] %v3454_v40  ;;  %v2713_v49 = vadd.f32 %v2712_v24, %v2711_v33 }
 0x179   :  { %v2714_v50 = vpop.f32.mrf.mxu1  ;;  %v3458_v52 = vpop.f32.mrf.mxu0 }
 0x17a   :  { %v3461_v57 = vadd.f32 %v2713_v49, %v1460_v38 }
 0x17b   :  { %v2715_v60 = vpop.f32.mrf.mxu1  ;;  %v3463_v1 = vpop.f32.mrf.mxu0 }
 0x17c   :  { %3725 = vst [vmem:[#allocation15_spill] sm:$0xff] %v3461_v57  ;;  %v2716_v19 = vadd.f32 %v2715_v60, %v2714_v50 }
 0x17d   :  { %v2717_v56 = vpop.f32.mrf.mxu1  ;;  %v3465_v58 = vpop.f32.mrf.mxu0 }
 0x17e   :  { %v3468_v5 = vadd.f32 %v2716_v19, %v1465_v54 }
 0x17f   :  { %v2718_v51 = vpop.f32.mrf.mxu1  ;;  %v3470_v7 = vpop.f32.mrf.mxu0 }
 0x180   :  { %3726 = vst [vmem:[#allocation16_spill] sm:$0xff] %v3468_v5  ;;  %v2719_v12 = vadd.f32 %v2718_v51, %v2717_v56  ;;  %v1481_v51 = vadd.f32 %v3281_v25, %v3322_v22 }
 0x181   :  { %v2720_v23 = vpop.f32.mrf.mxu1  ;;  %v3472_v28 = vpop.f32.mrf.mxu0 }
 0x182   :  { %v3475_v29 = vadd.f32 %v2719_v12, %v1468_v8 }
 0x183   :  { %v2721_v31 = vpop.f32.mrf.mxu1  ;;  %v3477_v39 = vpop.f32.mrf.mxu0 }
 0x184   :  { %3727 = vst [vmem:[#allocation17_spill] sm:$0xff] %v3475_v29  ;;  %v2722_v4 = vadd.f32 %v2721_v31, %v2720_v23 }
 0x185   :  { %v2723_v33 = vpop.f32.mrf.mxu1  ;;  %v3479_v38 = vpop.f32.mrf.mxu0 }
 0x186   :  { %v3482_v24 = vadd.f32 %v2722_v4, %v1473_v17 }
 0x187   :  { %v2724_v49 = vpop.f32.mrf.mxu1  ;;  %v3484_v50 = vpop.f32.mrf.mxu0 }
 0x188   :  { %3728 = vst [vmem:[#allocation18_spill] sm:$0xff] %v3482_v24  ;;  %v2725_v54 = vadd.f32 %v2724_v49, %v2723_v33  ;;  %v1484_v33 = vadd.f32 %v3287_v34, %v3322_v22 }
 0x189   :  { %v2726_v60 = vpop.f32.mrf.mxu1  ;;  %v3486_v19 = vpop.f32.mrf.mxu0 }
 0x18a   :  { %v3488_v47 = vadd.f32 %v2725_v54, %v1476_v30 }
 0x18b   :  { %v2727_v56 = vpop.f32.mrf.mxu1  ;;  %v3490_v8 = vpop.f32.mrf.mxu0 }
 0x18c   :  { %3729 = vst [vmem:[#allocation19_spill] sm:$0xff] %v3488_v47  ;;  %v2728_v12 = vadd.f32 %v2727_v56, %v2726_v60  ;;  %v1489_v60 = vadd.f32 %v3291_v44, %v3322_v22 }
 0x18d   :  { %v2729_v23 = vpop.f32.mrf.mxu1  ;;  %v3494_v0 = vpop.f32.mrf.mxu0 }
 0x18e   :  { %v3496_v17 = vadd.f32 %v2728_v12, %v1481_v51 }
 0x18f   :  { %v2730_v31 = vpop.f32.mrf.mxu1  ;;  %v3498_v4 = vpop.f32.mrf.mxu0 }
 0x190   :  { %3730 = vst [vmem:[#allocation20_spill] sm:$0xff] %v3496_v17  ;;  %v2731_v30 = vadd.f32 %v2730_v31, %v2729_v23  ;;  %v1492_v23 = vadd.f32 %v3297_v53, %v3322_v22 }
 0x191   :  { %v2732_v49 = vpop.f32.mrf.mxu1  ;;  %v3502_v54 = vpop.f32.mrf.mxu0 }
 0x192   :  { %v3504_v47 = vadd.f32 %v2731_v30, %v1484_v33 }
 0x193   :  { %v2733_v24 = vpop.f32.mrf.mxu1  ;;  %v3506_v25 = vpop.f32.mrf.mxu0 }
 0x194   :  { %3731 = vst [vmem:[#allocation21_spill] sm:$0xff] %v3504_v47  ;;  %v2734_v56 = vadd.f32 %v2733_v24, %v2732_v49  ;;  %v1497_v24 = vadd.f32 %v3301_v62, %v3322_v22 }
 0x195   :  { %v2735_v51 = vpop.f32.mrf.mxu1  ;;  %v3510_v12 = vpop.f32.mrf.mxu0 }
 0x196   :  { %v3512_v17 = vadd.f32 %v2734_v56, %v1489_v60 }
 0x197   :  { %v2736_v29 = vpop.f32.mrf.mxu1  ;;  %v3514_v34 = vpop.f32.mrf.mxu0 }
 0x198   :  { %3732 = vst [vmem:[#allocation22_spill] sm:$0xff] %v3512_v17  ;;  %v2737_v31 = vadd.f32 %v2736_v29, %v2735_v51  ;;  %v1500_v29 = vadd.f32 %v3307_v6, %v3322_v22 }
 0x199   :  { %v2738_v33 = vpop.f32.mrf.mxu1  ;;  %v3518_v30 = vpop.f32.mrf.mxu0 }
 0x19a   :  { %v3520_v47 = vadd.f32 %v2737_v31, %v1492_v23 }
 0x19b   :  { %v2739_v5 = vpop.f32.mrf.mxu1  ;;  %v3522_v44 = vpop.f32.mrf.mxu0 }
 0x19c   :  { %3733 = vst [vmem:[#allocation23_spill] sm:$0xff] %v3520_v47  ;;  %v2740_v49 = vadd.f32 %v2739_v5, %v2738_v33  ;;  %v1505_v5 = vadd.f32 %v3311_v14, %v3322_v22 }
 0x19d   :  { %v2741_v60 = vpop.f32.mrf.mxu1  ;;  %v3526_v56 = vpop.f32.mrf.mxu0 }
 0x19e   :  { %v3528_v17 = vadd.f32 %v2740_v49, %v1497_v24 }
 0x19f   :  { %v2742_v57 = vpop.f32.mrf.mxu1  ;;  %v3530_v53 = vpop.f32.mrf.mxu0 }
 0x1a0   :  { %3734 = vst [vmem:[#allocation24_spill] sm:$0xff] %v3528_v17  ;;  %v2743_v51 = vadd.f32 %v2742_v57, %v2741_v60  ;;  %v1508_v57 = vadd.f32 %v3317_v21, %v3322_v22 }
 0x1a1   :  { %v2744_v23 = vpop.f32.mrf.mxu1  ;;  %v3534_v31 = vpop.f32.mrf.mxu0 }
 0x1a2   :  { %v3536_v47 = vadd.f32 %v2743_v51, %v1500_v29 }
 0x1a3   :  { %v2745_v40 = vpop.f32.mrf.mxu1  ;;  %v3538_v62 = vpop.f32.mrf.mxu0 }
 0x1a4   :  { %3735 = vst [vmem:[#allocation25_spill] sm:$0xff] %v3536_v47  ;;  %v2746_v33 = vadd.f32 %v2745_v40, %v2744_v23  ;;  %v2768_v47 = vadd.f32 %v3432_v43, %v3426_v2 }
 0x1a5   :  { %v2747_v24 = vpop.f32.mrf.mxu1  ;;  %v3542_v49 = vpop.f32.mrf.mxu0 }
 0x1a6   :  { %v3544_v17 = vadd.f32 %v2746_v33, %v1505_v5  ;;  %v2771_v5 = vadd.f32 %v3440_v27, %v3434_v9  ;;  %v1707_v21 = vadd.f32 %v2768_v47, %v3333_v42  ;;  %v2777_v9 = vadd.f32 %v3456_v32, %v3450_v46 }
 0x1a7   :  { %v2748_v36 = vpop.f32.mrf.mxu1  ;;  %v3546_v6 = vpop.f32.mrf.mxu0  ;;  %v2780_v46 = vadd.f32 %v3463_v1, %v3458_v52 }
 0x1a8   :  { %3736 = vst [vmem:[#allocation26_spill] sm:$0xff] %v3544_v17  ;;  %v2749_v60 = vadd.f32 %v2748_v36, %v2747_v24  ;;  %v1710_v36 = vadd.f32 %v2771_v5, %v3341_v55 }
 0x1a9   :  { %v3550_v29 = vpop.f32.mrf.mxu0  ;;  %v2878_v51 = vpop.f32.mrf.mxu1 }
 0x1aa   :  { %3737 = vst [vmem:[#allocation27_spill] sm:$0xff] %v3550_v29  ;;  %v3554_v14 = vadd.f32 %v2749_v60, %v1508_v57  ;;  %v2774_v57 = vadd.f32 %v3448_v61, %v3442_v20 }
 0x1ab   :  { %v3556_v40 = vpop.f32.mrf.mxu0  ;;  %v2879_v23 = vpop.f32.mrf.mxu1 }
 0x1ac   :  { %3738 = vst [vmem:[#allocation28_spill] sm:$0xff] %v3554_v14  ;;  %v2880_v33 = vadd.f32 %v2879_v23, %v2878_v51  ;;  %v1715_v55 = vadd.f32 %v2774_v57, %v3348_v45  ;;  %v1723_v57 = vadd.f32 %v2780_v46, %v3363_v63 }
 0x1ad   :  { %v3560_v17 = vpop.f32.mrf.mxu0  ;;  %v2881_v16 = vpop.f32.mrf.mxu1 }
 0x1ae   :  { %v1868_v24 = vadd.f32 %v2880_v33, %v1707_v21  ;;  %v1718_v33 = vadd.f32 %v2777_v9, %v3356_v18 }
 0x1af   :  { %v2882_v22 = vpop.f32.mrf.mxu1  ;;  %v3564_v2 = vpop.f32.mrf.mxu0 }
 0x1b0   :  { %v2883_v29 = vadd.f32 %v2882_v22, %v2881_v16  ;;  %v1994_v27 = vmax.f32 %v1868_v24, 0.0 }
 0x1b1   :  { %v2884_v43 = vpop.f32.mrf.mxu1  ;;  %v3570_v42 = vpop.f32.mrf.mxu0 }
 0x1b2   :  { %v1871_v60 = vadd.f32 %v2883_v29, %v1710_v36 }
 0x1b3   :  { %v2885_v14 = vpop.f32.mrf.mxu1  ;;  %v3574_v20 = vpop.f32.mrf.mxu0 }
 0x1b4   :  { %v1995_v51 = vmax.f32 %v1871_v60, 0.0  ;;  %v2886_v23 = vadd.f32 %v2885_v14, %v2884_v43  ;;  %v2783_v14 = vadd.f32 %v3470_v7, %v3465_v58  ;;  %v2786_v58 = vadd.f32 %v3477_v39, %v3472_v28 }
 0x1b5   :  { %v2887_v47 = vpop.f32.mrf.mxu1  ;;  %v3580_v43 = vpop.f32.mrf.mxu0 }
 0x1b6   :  { %v2026_v16 = vpack.c.bf16 %v1995_v51, %v1994_v27  ;;  %v1876_v21 = vadd.f32 %v2886_v23, %v1715_v55  ;;  %v1726_v27 = vadd.f32 %v2783_v14, %v3371_v48  ;;  %v2789_v55 = vadd.f32 %v3484_v50, %v3479_v38 }
 0x1b7   :  { %v2888_v5 = vpop.f32.mrf.mxu1  ;;  %v3584_v52 = vpop.f32.mrf.mxu0  ;;  %v2792_v38 = vadd.f32 %v3490_v8, %v3486_v19 }
 0x1b8   :  { %v2889_v22 = vadd.f32 %v2888_v5, %v2887_v47  ;;  %3014 = vmatprep.mubr.bf16.mxu0 %v2026_v16  ;;  %v1996_v36 = vmax.f32 %v1876_v21, 0.0  ;;  %v1731_v21 = vadd.f32 %v2786_v58, %v3378_v13  ;;  %v1734_v46 = vadd.f32 %v2789_v55, %v3386_v10 }
 0x1b9   :  { %v2890_v61 = vpop.f32.mrf.mxu1  ;;  %v2801_v58 = vadd.f32 %v3514_v34, %v3510_v12  ;;  %v2804_v12 = vadd.f32 %v3522_v44, %v3518_v30 }
 0x1ba   :  { %v1879_v32 = vadd.f32 %v2889_v22, %v1718_v33  ;;  %v3590_v33 = vpop.f32.mrf.mxu0 }
 0x1bb   :  { %v2891_v29 = vpop.f32.mrf.mxu1 }
 0x1bc   :  { %v1997_v45 = vmax.f32 %v1879_v32, 0.0  ;;  %v2892_v24 = vadd.f32 %v2891_v29, %v2890_v61  ;;  %v3594_v28 = vpop.f32.mrf.mxu0 }
 0x1bd   :  { %v2893_v18 = vpop.f32.mrf.mxu1 }
 0x1be   :  { %v2027_v60 = vpack.c.bf16 %v1997_v45, %v1996_v36  ;;  %v1884_v51 = vadd.f32 %v2892_v24, %v1723_v57  ;;  %v2795_v36 = vadd.f32 %v3498_v4, %v3494_v0  ;;  %v1739_v57 = vadd.f32 %v2792_v38, %v3391_v35 }
 0x1bf   :  { %v2894_v9 = vpop.f32.mrf.mxu1  ;;  %v2798_v0 = vadd.f32 %v3506_v25, %v3502_v54  ;;  %v1755_v38 = vadd.f32 %v2804_v12, %v3415_v37 }
 0x1c0   :  { %v2895_v23 = vadd.f32 %v2894_v9, %v2893_v18  ;;  %3015 = vmatmul.mubr.bf16.vlgmr.msra.gmra.mxu0 %v2027_v60  ;;  %v1998_v16 = vmax.f32 %v1884_v51, 0.0  ;;  %v3600_v18 = vpop.f32.mrf.mxu0 }
 0x1c1   :  { %v2896_v1 = vpop.f32.mrf.mxu1 }
 0x1c2   :  { %v1887_v7 = vadd.f32 %v2895_v23, %v1726_v27  ;;  %v1742_v27 = vadd.f32 %v2795_v36, %v3399_v26  ;;  %v3604_v19 = vpop.f32.mrf.mxu0 }
 0x1c3   :  { %v2897_v47 = vpop.f32.mrf.mxu1 }
 0x1c4   :  { %v1999_v63 = vmax.f32 %v1887_v7, 0.0  ;;  %v2898_v5 = vadd.f32 %v2897_v47, %v2896_v1  ;;  %v3610_v55 = vpop.f32.mrf.mxu0 }
 0x1c5   :  { %v2899_v48 = vpop.f32.mrf.mxu1 }
 0x1c6   :  { %v2028_v22 = vpack.c.bf16 %v1999_v63, %v1998_v16  ;;  %v1892_v32 = vadd.f32 %v2898_v5, %v1731_v21  ;;  %v1747_v16 = vadd.f32 %v2798_v0, %v3404_v3  ;;  %v3614_v54 = vpop.f32.mrf.mxu0 }
 0x1c7   :  { %v2900_v61 = vpop.f32.mrf.mxu1 }
 0x1c8   :  { %v2901_v29 = vadd.f32 %v2900_v61, %v2899_v48  ;;  %3018 = vmatprep.mubr.bf16.mxu0 %v2028_v22  ;;  %v2000_v45 = vmax.f32 %v1892_v32, 0.0  ;;  %v1750_v48 = vadd.f32 %v2801_v58, %v3412_v11 }
 0x1c9   :  { %v2902_v39 = vpop.f32.mrf.mxu1 }
 0x1ca   :  { %v1895_v50 = vadd.f32 %v2901_v29, %v1734_v46  ;;  %v2807_v46 = vadd.f32 %v3530_v53, %v3526_v56  ;;  %v2810_v56 = vadd.f32 %v3538_v62, %v3534_v31 }
 0x1cb   :  { %v2903_v14 = vpop.f32.mrf.mxu1 }
 0x1cc   :  { %v2001_v13 = vmax.f32 %v1895_v50, 0.0  ;;  %v2904_v24 = vadd.f32 %v2903_v14, %v2902_v39  ;;  %v3620_v39 = vpop.f32.mrf.mxu0  ;;  %v1758_v36 = vadd.f32 %v2807_v46, %v3421_v41  ;;  %v2825_v46 = vadd.f32 %v3584_v52, %v3580_v43 }
 0x1cd   :  { %v2905_v10 = vpop.f32.mrf.mxu1  ;;  %v2828_v43 = vadd.f32 %v3594_v28, %v3590_v33 }
 0x1ce   :  { %v2029_v60 = vpack.c.bf16 %v2001_v13, %v2000_v45  ;;  %v1900_v51 = vadd.f32 %v2904_v24, %v1739_v57  ;;  %v3624_v30 = vpop.f32.mrf.mxu0 }
 0x1cf   :  { %v2906_v9 = vpop.f32.mrf.mxu1 }
 0x1d0   :  { %v2907_v23 = vadd.f32 %v2906_v9, %v2905_v10  ;;  %3019 = vmatmul.mubr.bf16.gmra.mxu0 %v2029_v60  ;;  %v2002_v7 = vmax.f32 %v1900_v51, 0.0  ;;  %v2813_v10 = vadd.f32 %v3546_v6, %v3542_v49  ;;  %v3630_v9 = vpop.f32.mrf.mxu0 }
 0x1d1   :  { %v2908_v8 = vpop.f32.mrf.mxu1 }
 0x1d2   :  { %v1903_v4 = vadd.f32 %v2907_v23, %v1742_v27  ;;  %v1763_v27 = vadd.f32 %v2810_v56, %v3424_v59  ;;  %v3634_v31 = vpop.f32.mrf.mxu0 }
 0x1d3   :  { %v2909_v1 = vpop.f32.mrf.mxu1 }
 0x1d4   :  { %v2003_v35 = vmax.f32 %v1903_v4, 0.0  ;;  %v2910_v47 = vadd.f32 %v2909_v1, %v2908_v8  ;;  %v1766_v8 = vadd.f32 %v2813_v10, %v3430_v15  ;;  %v3739_v1 = vld [vmem:[#allocation27_spill] sm:$0xff]  ;;  %v2831_v10 = vadd.f32 %v3604_v19, %v3600_v18 }
 0x1d5   :  { %v2911_v26 = vpop.f32.mrf.mxu1  ;;  %v2816_v49 = vadd.f32 %v3556_v40, %v3739_v1 }
 0x1d6   :  { %v2030_v63 = vpack.c.bf16 %v2003_v35, %v2002_v7  ;;  %v1908_v21 = vadd.f32 %v2910_v47, %v1747_v16  ;;  %v2819_v7 = vadd.f32 %v3564_v2, %v3560_v17  ;;  %v3740_v16 = vld [vmem:[#allocation12_spill] sm:$0xff]  ;;  %v2822_v17 = vadd.f32 %v3574_v20, %v3570_v42 }
 0x1d7   :  { %v2912_v5 = vpop.f32.mrf.mxu1 }
 0x1d8   :  { %v2913_v22 = vadd.f32 %v2912_v5, %v2911_v26  ;;  %3022 = vmatprep.mubr.bf16.mxu0 %v2030_v63  ;;  %v2004_v32 = vmax.f32 %v1908_v21, 0.0  ;;  %v3640_v26 = vpop.f32.mrf.mxu0  ;;  %v1771_v63 = vadd.f32 %v2816_v49, %v3740_v16  ;;  %v3741_v21 = vld [vmem:[#allocation13_spill] sm:$0xff]  ;;  %v3746_v16 = vld [vmem:[#allocation18_spill] sm:$0xff] }
 0x1d9   :  { %v2914_v25 = vpop.f32.mrf.mxu1 }
 0x1da   :  { %v1911_v34 = vadd.f32 %v2913_v22, %v1750_v48  ;;  %v1774_v22 = vadd.f32 %v2819_v7, %v3741_v21  ;;  %v2842_v40 = vpop.f32.mrf.mxu0  ;;  %v3747_v21 = vld [vmem:[#allocation19_spill] sm:$0xff] }
 0x1db   :  { %v2915_v61 = vpop.f32.mrf.mxu1 }
 0x1dc   :  { %v2005_v3 = vmax.f32 %v1911_v34, 0.0  ;;  %v2916_v29 = vadd.f32 %v2915_v61, %v2914_v25 }
 0x1dd   :  { %v2917_v11 = vpop.f32.mrf.mxu1 }
 0x1de   :  { %v2031_v50 = vpack.c.bf16 %v2005_v3, %v2004_v32  ;;  %v1916_v45 = vadd.f32 %v2916_v29, %v1755_v38 }
 0x1df   :  { %v2918_v14 = vpop.f32.mrf.mxu1 }
 0x1e0   :  { %v2919_v13 = vadd.f32 %v2918_v14, %v2917_v11  ;;  %3023 = vmatmul.mubr.bf16.gmra.mxu0 %v2031_v50  ;;  %v2006_v57 = vmax.f32 %v1916_v45, 0.0  ;;  %v3648_v11 = vpop.f32.mrf.mxu0  ;;  %v3742_v50 = vld [vmem:[#allocation14_spill] sm:$0xff] }
 0x1e1   :  { %v2920_v44 = vpop.f32.mrf.mxu1  ;;  %v1779_v14 = vadd.f32 %v2822_v17, %v3742_v50  ;;  %v2843_v17 = vadd.f32 %v2842_v40, %v3640_v26 }
 0x1e2   :  { %v1919_v53 = vadd.f32 %v2919_v13, %v1758_v36  ;;  %v3743_v13 = vld [vmem:[#allocation15_spill] sm:$0xff]  ;;  %v2845_v42 = vpop.f32.mrf.mxu0 }
 0x1e3   :  { %v2921_v24 = vpop.f32.mrf.mxu1 }
 0x1e4   :  { %v2007_v37 = vmax.f32 %v1919_v53, 0.0  ;;  %v2922_v60 = vadd.f32 %v2921_v24, %v2920_v44  ;;  %v1782_v44 = vadd.f32 %v2825_v46, %v3743_v13 }
 0x1e5   :  { %v2923_v41 = vpop.f32.mrf.mxu1 }
 0x1e6   :  { %v2032_v51 = vpack.c.bf16 %v2007_v37, %v2006_v57  ;;  %v1924_v0 = vadd.f32 %v2922_v60, %v1763_v27 }
 0x1e7   :  { %v2924_v23 = vpop.f32.mrf.mxu1 }
 0x1e8   :  { %v2925_v4 = vadd.f32 %v2924_v23, %v2923_v41  ;;  %3026 = vmatprep.mubr.bf16.mxu0 %v2032_v51  ;;  %v2008_v35 = vmax.f32 %v1924_v0, 0.0  ;;  %v2847_v41 = vpop.f32.mrf.mxu0  ;;  %v3744_v51 = vld [vmem:[#allocation16_spill] sm:$0xff] }
 0x1e9   :  { %v2926_v62 = vpop.f32.mrf.mxu1  ;;  %v1787_v23 = vadd.f32 %v2828_v43, %v3744_v51  ;;  %v3751_v51 = vld [vmem:[#allocation23_spill] sm:$0xff] }
 0x1ea   :  { %v1927_v6 = vadd.f32 %v2925_v4, %v1766_v8  ;;  %v3745_v4 = vld [vmem:[#allocation17_spill] sm:$0xff]  ;;  %v2848_v33 = vpop.f32.mrf.mxu0 }
 0x1eb   :  { %v2927_v58 = vpop.f32.mrf.mxu1  ;;  %v2849_v40 = vadd.f32 %v2848_v33, %v2847_v41 }
 0x1ec   :  { %v2009_v59 = vmax.f32 %v1927_v6, 0.0  ;;  %v2928_v47 = vadd.f32 %v2927_v58, %v2926_v62  ;;  %v1790_v62 = vadd.f32 %v2831_v10, %v3745_v4  ;;  %v2834_v6 = vadd.f32 %v3614_v54, %v3610_v55 }
 0x1ed   :  { %v2929_v15 = vpop.f32.mrf.mxu1  ;;  %v2837_v58 = vadd.f32 %v3624_v30, %v3620_v39 }
 0x1ee   :  { %v2033_v5 = vpack.c.bf16 %v2009_v59, %v2008_v35  ;;  %v1932_v25 = vadd.f32 %v2928_v47, %v1771_v63  ;;  %v2850_v47 = vpop.f32.mrf.mxu0  ;;  %v1795_v63 = vadd.f32 %v2834_v6, %v3746_v16 }
 0x1ef   :  { %v2930_v48 = vpop.f32.mrf.mxu1 }
 0x1f0   :  { %v2931_v12 = vadd.f32 %v2930_v48, %v2929_v15  ;;  %3027 = vmatmul.mubr.bf16.gmra.mxu0 %v2033_v5  ;;  %v2010_v32 = vmax.f32 %v1932_v25, 0.0  ;;  %v2851_v55 = vpop.f32.mrf.mxu0 }
 0x1f1   :  { %v2932_v34 = vpop.f32.mrf.mxu1 }
 0x1f2   :  { %v1935_v2 = vadd.f32 %v2931_v12, %v1774_v22  ;;  %v1798_v22 = vadd.f32 %v2837_v58, %v3747_v21 }
 0x1f3   :  { %v2933_v61 = vpop.f32.mrf.mxu1 }
 0x1f4   :  { %v2011_v3 = vmax.f32 %v1935_v2, 0.0  ;;  %v2934_v29 = vadd.f32 %v2933_v61, %v2932_v34  ;;  %v2840_v34 = vadd.f32 %v3634_v31, %v3630_v9  ;;  %v2846_v31 = vadd.f32 %v2845_v42, %v3648_v11 }
 0x1f5   :  { %v2935_v38 = vpop.f32.mrf.mxu1  ;;  %v2852_v11 = vadd.f32 %v2851_v55, %v2850_v47 }
 0x1f6   :  { %v2034_v36 = vpack.c.bf16 %v2011_v3, %v2010_v32  ;;  %v1940_v56 = vadd.f32 %v2934_v29, %v1779_v14  ;;  %v2853_v32 = vpop.f32.mrf.mxu0  ;;  %v3748_v29 = vld [vmem:[#allocation20_spill] sm:$0xff] }
 0x1f7   :  { %v2936_v45 = vpop.f32.mrf.mxu1 }
 0x1f8   :  { %v2937_v53 = vadd.f32 %v2936_v45, %v2935_v38  ;;  %3030 = vmatprep.mubr.bf16.mxu0 %v2034_v36  ;;  %v2012_v57 = vmax.f32 %v1940_v56, 0.0  ;;  %v1803_v38 = vadd.f32 %v2840_v34, %v3748_v29  ;;  %v3749_v36 = vld [vmem:[#allocation21_spill] sm:$0xff]  ;;  %v2854_v56 = vpop.f32.mrf.mxu0 }
 0x1f9   :  { %v2938_v20 = vpop.f32.mrf.mxu1  ;;  %v1806_v45 = vadd.f32 %v2843_v17, %v3749_v36  ;;  %v2855_v41 = vadd.f32 %v2854_v56, %v2853_v32  ;;  %v3679_v36 = vld [vmem:[%s3720_s4] ss:$0 sm:$0xff]  ;;  %s3237_s4 = smov [#allocation8]  }
 0x1fa   :  { %v1943_v52 = vadd.f32 %v2937_v53, %v1782_v44  ;;  %s2311_s12 = sshll.u32 %s3237_s4, 4  ;;  %s2312_s12 = int_to_ptr.vmem [resolvable:$true] %s2311_s12 }
 0x1fb   :  { %v2939_v24 = vpop.f32.mrf.mxu1  ;;  %s3204_s13 = scalar_lea.vmem %s2312_s12, 4096  ;;  %p3209_p2 = scmp.lt.s32.totalorder %s2312_s12, %s2312_s12 }
 0x1fc   :  { %v2013_v37 = vmax.f32 %v1943_v52, 0.0  ;;  %v2940_v60 = vadd.f32 %v2939_v24, %v2938_v20  ;;  %v2856_v24 = vpop.f32.mrf.mxu0  ;;  %p3205_p1 = scmp.ne.s32.totalorder %s2312_s12, %s3204_s13  ;;  %p3210_p3 = scmp.lt.s32.totalorder %s3204_s13, %s3204_s13 }
 0x1fd   :  { %v2941_v27 = vpop.f32.mrf.mxu1 }
 0x1fe   :  { %v2035_v8 = vpack.c.bf16 %v2013_v37, %v2012_v57  ;;  %v1948_v1 = vadd.f32 %v2940_v60, %v1787_v23  ;;  %v3750_v57 = vld [vmem:[#allocation22_spill] sm:$0xff]  ;;  %v1814_v23 = vadd.f32 %v2849_v40, %v3751_v51  ;;  %v2857_v4 = vpop.f32.mrf.mxu0  ;;  %p3211_p4 = por %p3210_p3, %p3209_p2 }
 0x1ff   :  { %v2942_v0 = vpop.f32.mrf.mxu1  ;;  %v1811_v37 = vadd.f32 %v2846_v31, %v3750_v57  ;;  %v2858_v47 = vadd.f32 %v2857_v4, %v2856_v24 }
 0x200   :  { %v2943_v49 = vadd.f32 %v2942_v0, %v2941_v27  ;;  %3031 = vmatmul.mubr.bf16.gmra.mxu0 %v2035_v8  ;;  %v2014_v7 = vmax.f32 %v1948_v1, 0.0  ;;  %v2859_v6 = vpop.f32.mrf.mxu0  ;;  %p3212_p5 = pnand %p3211_p4, %p3205_p1 }
 0x201   :  { %v2944_v28 = vpop.f32.mrf.mxu1 }
 0x202   :  { %v1951_v18 = vadd.f32 %v2943_v49, %v1790_v62 }
 0x203   :  { %v2945_v19 = vpop.f32.mrf.mxu1 }
 0x204   :  { %v2015_v35 = vmax.f32 %v1951_v18, 0.0  ;;  %v2946_v59 = vadd.f32 %v2945_v19, %v2944_v28  ;;  %v3752_v19 = vld [vmem:[#allocation24_spill] sm:$0xff] }
 0x205   :  { %v2947_v15 = vpop.f32.mrf.mxu1  ;;  %v1819_v58 = vadd.f32 %v2852_v11, %v3752_v19 }
 0x206   :  { %v2036_v5 = vpack.c.bf16 %v2015_v35, %v2014_v7  ;;  %v1956_v25 = vadd.f32 %v2946_v59, %v1795_v63  ;;  %v3753_v59 = vld [vmem:[#allocation25_spill] sm:$0xff] }
 0x207   :  { %v2948_v48 = vpop.f32.mrf.mxu1 }
 0x208   :  { %v2949_v12 = vadd.f32 %v2948_v48, %v2947_v15  ;;  %3034 = vmatprep.mubr.bf16.mxu0 %v2036_v5  ;;  %v2016_v2 = vmax.f32 %v1956_v25, 0.0  ;;  %v1822_v15 = vadd.f32 %v2855_v41, %v3753_v59  ;;  %v2860_v5 = vpop.f32.mrf.mxu0 }
 0x209   :  { %v2950_v54 = vpop.f32.mrf.mxu1  ;;  %v2861_v25 = vadd.f32 %v2860_v5, %v2859_v6 }
 0x20a   :  { %v1959_v39 = vadd.f32 %v2949_v12, %v1798_v22 }
 0x20b   :  { %v2951_v30 = vpop.f32.mrf.mxu1 }
 0x20c   :  { %v2017_v61 = vmax.f32 %v1959_v39, 0.0  ;;  %v2952_v46 = vadd.f32 %v2951_v30, %v2950_v54  ;;  %v3754_v39 = vld [vmem:[#allocation26_spill] sm:$0xff] }
 0x20d   :  { %v2953_v3 = vpop.f32.mrf.mxu1  ;;  %v1827_v30 = vadd.f32 %v2858_v47, %v3754_v39 }
 0x20e   :  { %v2037_v50 = vpack.c.bf16 %v2017_v61, %v2016_v2  ;;  %v1964_v13 = vadd.f32 %v2952_v46, %v1803_v38  ;;  %v3755_v61 = vld [vmem:[#allocation28_spill] sm:$0xff] }
 0x20f   :  { %v2954_v14 = vpop.f32.mrf.mxu1  ;;  %v1830_v46 = vadd.f32 %v2861_v25, %v3755_v61 }
 0x210   :  { %v2955_v44 = vadd.f32 %v2954_v14, %v2953_v3  ;;  %3035 = vmatmul.mubr.bf16.gmra.mxu0 %v2037_v50  ;;  %v2018_v20 = vmax.f32 %v1964_v13, 0.0 }
 0x211   :  { %v2956_v9 = vpop.f32.mrf.mxu1 }
 0x212   :  { %v1967_v53 = vadd.f32 %v2955_v44, %v1806_v45 }
 0x213   :  { %v2957_v26 = vpop.f32.mrf.mxu1 }
 0x214   :  { %v2019_v43 = vmax.f32 %v1967_v53, 0.0  ;;  %v2958_v52 = vadd.f32 %v2957_v26, %v2956_v9 }
 0x215   :  { %v2959_v10 = vpop.f32.mrf.mxu1 }
 0x216   :  { %v2038_v60 = vpack.c.bf16 %v2019_v43, %v2018_v20  ;;  %v1972_v8 = vadd.f32 %v2958_v52, %v1811_v37 }
 0x217   :  { %v2960_v27 = vpop.f32.mrf.mxu1 }
 0x218   :  { %v2961_v0 = vadd.f32 %v2960_v27, %v2959_v10  ;;  %3038 = vmatprep.mubr.bf16.mxu0 %v2038_v60  ;;  %v2020_v49 = vmax.f32 %v1972_v8, 0.0 }
 0x219   :  { %v2962_v62 = vpop.f32.mrf.mxu1 }
 0x21a   :  { %v1975_v42 = vadd.f32 %v2961_v0, %v1814_v23 }
 0x21b   :  { %v2963_v1 = vpop.f32.mrf.mxu1 }
 0x21c   :  { %v2021_v33 = vmax.f32 %v1975_v42, 0.0  ;;  %v2964_v28 = vadd.f32 %v2963_v1, %v2962_v62 }
 0x21d   :  { %v2965_v18 = vpop.f32.mrf.mxu1 }
 0x21e   :  { %v2039_v7 = vpack.c.bf16 %v2021_v33, %v2020_v49  ;;  %v1980_v16 = vadd.f32 %v2964_v28, %v1819_v58 }
 0x21f   :  { %v2966_v35 = vpop.f32.mrf.mxu1 }
 0x220   :  { %v2967_v63 = vadd.f32 %v2966_v35, %v2965_v18  ;;  %3039 = vmatmul.mubr.bf16.gmra.mxu0 %v2039_v7  ;;  %v2022_v12 = vmax.f32 %v1980_v16, 0.0 }
 0x221   :  { %v2968_v48 = vpop.f32.mrf.mxu1 }
 0x222   :  { %v1983_v21 = vadd.f32 %v2967_v63, %v1822_v15 }
 0x223   :  { %v2969_v22 = vpop.f32.mrf.mxu1 }
 0x224   :  { %v2023_v55 = vmax.f32 %v1983_v21, 0.0  ;;  %v2970_v54 = vadd.f32 %v2969_v22, %v2968_v48 }
 0x225   :  { %v2971_v34 = vpop.f32.mrf.mxu1 }
 0x226   :  { %v2040_v17 = vpack.c.bf16 %v2023_v55, %v2022_v12  ;;  %v1988_v32 = vadd.f32 %v2970_v54, %v1827_v30 }
 0x227   :  { %v2972_v2 = vpop.f32.mrf.mxu1 }
 0x228   :  { %v2973_v3 = vadd.f32 %v2972_v2, %v2971_v34  ;;  %3042 = vmatprep.mubr.bf16.mxu0 %v2040_v17  ;;  %v2024_v38 = vmax.f32 %v1988_v32, 0.0 }
 0x22a   :  { %v1991_v29 = vadd.f32 %v2973_v3, %v1830_v46 }
 0x22c   :  { %v2025_v50 = vmax.f32 %v1991_v29, 0.0 }
 0x22e   :  { %v2041_v14 = vpack.c.bf16 %v2025_v50, %v2024_v38 }
 0x230   :  { %3043 = vmatmul.mubr.bf16.gmra.mxu0 %v2041_v14 }
 0x280   :  { %v3016_v45 = vpop.f32.mrf.mxu0 }
 0x281   :  { %v2156_v13 = vadd.f32 %v3016_v45, %v3679_v36 }
 0x282   :  { %v2147_v44 = vpop.f32.mrf.mxu0 }
 0x283   :  { %2276 = vst [vmem:[#allocation8 + $0x10] sm:$0xff] %v2156_v13  ;;  %v2148_v56 = vadd.f32 %v3679_v36, %v2147_v44 }
 0x284   :  { %v3017_v9 = vpop.f32.mrf.mxu0 }
 0x285   :  { %2274 = vst [vmem:[#allocation8] sm:$0xff] %v2148_v56  ;;  %v2159_v31 = vadd.f32 %v3017_v9, %v3679_v36 }
 0x286   :  { %v2150_v53 = vpop.f32.mrf.mxu0 }
 0x287   :  { %2277 = vst [vmem:[#allocation8 + $0x18] sm:$0xff] %v2159_v31  ;;  %v2151_v26 = vadd.f32 %v3679_v36, %v2150_v53 }
 0x289   :  { %2275 = vst [vmem:[#allocation8 + $0x8] sm:$0xff] %v2151_v26 }
 0x290   :  { %v3020_v40 = vpop.f32.mrf.mxu0 }
 0x291   :  { %v2172_v20 = vadd.f32 %v3020_v40, %v3679_v36 }
 0x292   :  { %v2163_v43 = vpop.f32.mrf.mxu0 }
 0x293   :  { %2280 = vst [vmem:[#allocation8 + $0x30] sm:$0xff] %v2172_v20  ;;  %v2164_v52 = vadd.f32 %v3679_v36, %v2163_v43 }
 0x294   :  { %v3021_v24 = vpop.f32.mrf.mxu0 }
 0x295   :  { %2278 = vst [vmem:[#allocation8 + $0x20] sm:$0xff] %v2164_v52  ;;  %v2175_v10 = vadd.f32 %v3021_v24, %v3679_v36 }
 0x296   :  { %v2166_v57 = vpop.f32.mrf.mxu0 }
 0x297   :  { %2281 = vst [vmem:[#allocation8 + $0x38] sm:$0xff] %v2175_v10  ;;  %v2167_v37 = vadd.f32 %v3679_v36, %v2166_v57 }
 0x299   :  { %2279 = vst [vmem:[#allocation8 + $0x28] sm:$0xff] %v2167_v37 }
 0x2a0   :  { %v3024_v60 = vpop.f32.mrf.mxu0 }
 0x2a1   :  { %v2188_v27 = vadd.f32 %v3024_v60, %v3679_v36 }
 0x2a2   :  { %v2179_v51 = vpop.f32.mrf.mxu0 }
 0x2a3   :  { %2284 = vst [vmem:[#allocation8 + $0x50] sm:$0xff] %v2188_v27  ;;  %v2180_v23 = vadd.f32 %v3679_v36, %v2179_v51 }
 0x2a4   :  { %v3025_v8 = vpop.f32.mrf.mxu0 }
 0x2a5   :  { %2282 = vst [vmem:[#allocation8 + $0x40] sm:$0xff] %v2180_v23  ;;  %v2191_v0 = vadd.f32 %v3025_v8, %v3679_v36 }
 0x2a6   :  { %v2182_v4 = vpop.f32.mrf.mxu0 }
 0x2a7   :  { %2285 = vst [vmem:[#allocation8 + $0x58] sm:$0xff] %v2191_v0  ;;  %v2183_v62 = vadd.f32 %v3679_v36, %v2182_v4 }
 0x2a9   :  { %2283 = vst [vmem:[#allocation8 + $0x48] sm:$0xff] %v2183_v62 }
 0x2b0   :  { %v3028_v11 = vpop.f32.mrf.mxu0 }
 0x2b1   :  { %v2204_v42 = vadd.f32 %v3028_v11, %v3679_v36 }
 0x2b2   :  { %v2195_v1 = vpop.f32.mrf.mxu0 }
 0x2b3   :  { %2288 = vst [vmem:[#allocation8 + $0x70] sm:$0xff] %v2204_v42  ;;  %v2196_v41 = vadd.f32 %v3679_v36, %v2195_v1 }
 0x2b4   :  { %v3029_v49 = vpop.f32.mrf.mxu0 }
 0x2b5   :  { %2286 = vst [vmem:[#allocation8 + $0x60] sm:$0xff] %v2196_v41  ;;  %v2207_v33 = vadd.f32 %v3029_v49, %v3679_v36 }
 0x2b6   :  { %v2198_v28 = vpop.f32.mrf.mxu0 }
 0x2b7   :  { %2289 = vst [vmem:[#allocation8 + $0x78] sm:$0xff] %v2207_v33  ;;  %v2199_v6 = vadd.f32 %v3679_v36, %v2198_v28 }
 0x2b9   :  { %2287 = vst [vmem:[#allocation8 + $0x68] sm:$0xff] %v2199_v6 }
 0x2c0   :  { %v3032_v18 = vpop.f32.mrf.mxu0 }
 0x2c1   :  { %v2220_v19 = vadd.f32 %v3032_v18, %v3679_v36 }
 0x2c2   :  { %v2211_v58 = vpop.f32.mrf.mxu0 }
 0x2c3   :  { %2292 = vst [vmem:[#allocation8 + $0x90] sm:$0xff] %v2220_v19  ;;  %v2212_v7 = vadd.f32 %v3679_v36, %v2211_v58 }
 0x2c4   :  { %v3033_v35 = vpop.f32.mrf.mxu0 }
 0x2c5   :  { %2290 = vst [vmem:[#allocation8 + $0x80] sm:$0xff] %v2212_v7  ;;  %v2223_v59 = vadd.f32 %v3033_v35, %v3679_v36 }
 0x2c6   :  { %v2214_v15 = vpop.f32.mrf.mxu0 }
 0x2c7   :  { %2293 = vst [vmem:[#allocation8 + $0x98] sm:$0xff] %v2223_v59  ;;  %v2215_v16 = vadd.f32 %v3679_v36, %v2214_v15 }
 0x2c9   :  { %2291 = vst [vmem:[#allocation8 + $0x88] sm:$0xff] %v2215_v16 }
 0x2d0   :  { %v3036_v63 = vpop.f32.mrf.mxu0 }
 0x2d1   :  { %v2236_v5 = vadd.f32 %v3036_v63, %v3679_v36 }
 0x2d2   :  { %v2227_v48 = vpop.f32.mrf.mxu0 }
 0x2d3   :  { %2296 = vst [vmem:[#allocation8 + $0xb0] sm:$0xff] %v2236_v5  ;;  %v2228_v47 = vadd.f32 %v3679_v36, %v2227_v48 }
 0x2d4   :  { %v3037_v21 = vpop.f32.mrf.mxu0 }
 0x2d5   :  { %2294 = vst [vmem:[#allocation8 + $0xa0] sm:$0xff] %v2228_v47  ;;  %v2239_v22 = vadd.f32 %v3037_v21, %v3679_v36 }
 0x2d6   :  { %v2230_v25 = vpop.f32.mrf.mxu0 }
 0x2d7   :  { %2297 = vst [vmem:[#allocation8 + $0xb8] sm:$0xff] %v2239_v22  ;;  %v2231_v12 = vadd.f32 %v3679_v36, %v2230_v25 }
 0x2d9   :  { %2295 = vst [vmem:[#allocation8 + $0xa8] sm:$0xff] %v2231_v12 }
 0x2e0   :  { %v3040_v55 = vpop.f32.mrf.mxu0 }
 0x2e1   :  { %v2252_v54 = vadd.f32 %v3040_v55, %v3679_v36 }
 0x2e2   :  { %v2243_v34 = vpop.f32.mrf.mxu0 }
 0x2e3   :  { %2300 = vst [vmem:[#allocation8 + $0xd0] sm:$0xff] %v2252_v54  ;;  %v2244_v39 = vadd.f32 %v3679_v36, %v2243_v34 }
 0x2e4   :  { %v3041_v30 = vpop.f32.mrf.mxu0 }
 0x2e5   :  { %2298 = vst [vmem:[#allocation8 + $0xc0] sm:$0xff] %v2244_v39  ;;  %v2255_v17 = vadd.f32 %v3041_v30, %v3679_v36 }
 0x2e6   :  { %v2246_v2 = vpop.f32.mrf.mxu0 }
 0x2e7   :  { %2301 = vst [vmem:[#allocation8 + $0xd8] sm:$0xff] %v2255_v17  ;;  %v2247_v61 = vadd.f32 %v3679_v36, %v2246_v2 }
 0x2e9   :  { %2299 = vst [vmem:[#allocation8 + $0xc8] sm:$0xff] %v2247_v61 }
 0x2f0   :  { %v3044_v46 = vpop.f32.mrf.mxu0 }
 0x2f1   :  { %v2268_v32 = vadd.f32 %v3044_v46, %v3679_v36 }
 0x2f2   :  { %v2259_v3 = vpop.f32.mrf.mxu0 }
 0x2f3   :  { %2304 = vst [vmem:[#allocation8 + $0xf0] sm:$0xff] %v2268_v32  ;;  %v2260_v29 = vadd.f32 %v3679_v36, %v2259_v3 }
 0x2f4   :  { %v3045_v38 = vpop.f32.mrf.mxu0 }
 0x2f5   :  { %2302 = vst [vmem:[#allocation8 + $0xe0] sm:$0xff] %v2260_v29  ;;  %v2271_v50 = vadd.f32 %v3045_v38, %v3679_v36 }
 0x2f6   :  { %v2262_v14 = vpop.f32.mrf.mxu0 }
 0x2f7   :  { %2305 = vst [vmem:[#allocation8 + $0xf8] sm:$0xff] %v2271_v50  ;;  %v2263_v45 = vadd.f32 %v3679_v36, %v2262_v14 }
 0x2f9   :  { %2303 = vst [vmem:[#allocation8 + $0xe8] sm:$0xff] %v2263_v45 }
 0x2fa   :  { %3215 = shalt.err (!%p3212_p5)
}
 0x2fb   :  { %s3238_s14 = smov 128   ;;  %s3239_s15 = smov 8  }
 0x2fc   :  { %2317 = dma.vmem_to_hbm [thread:$0]  %s2312_s12, 4096, %s3721_s5, [#allocation4], %s3238_s14, %s3238_s14, %s3239_s15  }
 0x2fd   :  { %3228 = dma.done.wait [#allocation4], 4096  }
 0x2fe   :  { %3229 = vsyncadd [#allocation4], 4294963200 }
 0x2ff   :  { %2321 = vsyncpa [#allocation3], 1 }
 0x300   :  { %2322 = vsyncpa [#allocation6], 1 }
 0x301   :  { %2323 = vsyncpa [#allocation4], 1 }

</bundles_post_ra>
